<compile_context>
chip_gen: v5e
topology: v5e:2x2
jax: 0.10.0
libtpu: 0.0.40
codegen_flags: <defaults>
</compile_context>

<pallas_src>
import functools

import jax
import jax.numpy as jnp
from jax.experimental import pallas as pl
from jax.experimental.pallas import tpu as pltpu

C_PAD = 128                      # all layer channels padded to one lane width
STEM_CH = 16
BLOCK_CHS = (16, 24, 32, 40, 48, 64, 80)   # conv_pwl.out_channels analogue
HEAD_CH = 128                    # conv_head output channels (== C_PAD)
NORM_EPS = 1e-3

assert HEAD_CH == C_PAD


# ----------------------------------------------------------------------------
# Fused backbone Pallas kernel
# ----------------------------------------------------------------------------
def _fused_backbone_kernel(patches_ref, stem_w_ref, w_ref, shifts_ref,
                           cls_w_ref, cls_b_ref, out_ref,
                           *, n_layers, inv_hw, sub_m, n_sub):
    m = pl.program_id(1)

    def layer_chain(p_bf16):
        # conv_stem as matmul over im2col patches; BN scale is folded into the
        # weight columns, so the epilogue is shift-add + SiLU only.
        h = jnp.dot(p_bf16, stem_w_ref[...],
                    preferred_element_type=jnp.float32)        # [sub_m, C_PAD]
        h = h + shifts_ref[0]
        h = h * pl.reciprocal(1.0 + jnp.exp(-h), approx=True)  # SiLU (EUP recip)

        # blocks (pointwise convs) + conv_head: activations never leave VMEM.
        for l in range(n_layers):
            h = jnp.dot(h.astype(jnp.bfloat16), w_ref[l],
                        preferred_element_type=jnp.float32)
            h = h + shifts_ref[l + 1]
            h = h * pl.reciprocal(1.0 + jnp.exp(-h), approx=True)
        return h

    # Global-average-pool accumulator lives in the resident output block
    # (same block index for every m -> accumulator pattern).
    @pl.when(m == 0)
    def _init():
        out_ref[...] = jnp.zeros_like(out_ref)

    if n_sub == 1:
        h = layer_chain(patches_ref[...])
        out_ref[...] += jnp.sum(h, axis=0, keepdims=True)      # [1, C_PAD]
    else:
        # Sub-chunk the M tile so the carried activation stays in registers
        # (bounds vreg live range; pool partials accumulate in VMEM out_ref).
        @pl.loop(0, n_sub)
        def _chunk(i):
            start = pl.multiple_of(i * sub_m, sub_m)
            h = layer_chain(patches_ref[pl.ds(start, sub_m), :])
            out_ref[...] += jnp.sum(h, axis=0, keepdims=True)

    # Finalize on the last M tile: mean -> classifier as elementwise multiply
    # + lane reduction (no N=1 MXU matmul) -> +bias (SMEM scalar).  Broadcast
    # the scalar logit across 128 lanes so the store stays lane-dense.
    @pl.when(m == pl.num_programs(1) - 1)
    def _finalize():
        pooled = out_ref[...] * inv_hw                         # [1, C_PAD]
        logit = jnp.sum(pooled * cls_w_ref[...], axis=-1,
                        keepdims=True) + cls_b_ref[0]          # [1, 1]
        out_ref[...] = jnp.broadcast_to(logit, out_ref.shape)


def _choose_tile_m(hw, max_tile=2048):
    """Largest divisor of hw that is <= max_tile and (multiple of 8 or == hw)."""
    for t in range(min(hw, max_tile), 0, -1):
        if hw % t == 0 and (t % 8 == 0 or t == hw):
            return t
    return hw


def _choose_sub_m(tile_m, max_sub=256):
    """Largest divisor of tile_m that is <= max_sub and (multiple of 8 or == tile_m)."""
    for t in range(min(tile_m, max_sub), 0, -1):
        if tile_m % t == 0 and (t % 8 == 0 or t == tile_m):
            return t
    return tile_m


# ----------------------------------------------------------------------------
# Glue: im2col for the 3x3 stride-2 pad-1 stem conv (no compute; emits bf16,
# K padded to a multiple of 16 for bf16 sublane packing).
# ----------------------------------------------------------------------------
def im2col_3x3_s2(x_nhwc, kp_pad):
    B, H, W, C = x_nhwc.shape
    xp = jnp.pad(x_nhwc, ((0, 0), (1, 1), (1, 1), (0, 0)))
    Ho, Wo = H // 2, W // 2
    cols = [xp[:, kh:kh + 2 * Ho:2, kw:kw + 2 * Wo:2, :]
            for kh in range(3) for kw in range(3)]
    p = jnp.concatenate(cols, axis=-1)                          # [B, Ho, Wo, 9*C]
    kp = p.shape[-1]
    if kp_pad > kp:
        p = jnp.pad(p, ((0, 0), (0, 0), (0, 0), (0, kp_pad - kp)))
    return p.astype(jnp.bfloat16)                               # [B, Ho, Wo, kp_pad]


# ----------------------------------------------------------------------------
# Parameters (deterministic synthetic init; eval-mode BN folded; scale folded
# into the weights; everything lane-padded to 128)
# ----------------------------------------------------------------------------
def _fold_bn(gamma, beta, mean, var, eps=NORM_EPS):
    scale = gamma / jnp.sqrt(var + eps)
    shift = beta - mean * scale
    return scale, shift


def _rand_folded_bn(key, c):
    kg, kb, km = jax.random.split(key, 3)
    gamma = 1.0 + 0.05 * jax.random.normal(kg, (c,), jnp.float32)
    beta = 0.05 * jax.random.normal(kb, (c,), jnp.float32)
    mean = 0.05 * jax.random.normal(km, (c,), jnp.float32)
    var = jnp.ones((c,), jnp.float32)
    return _fold_bn(gamma, beta, mean, var)


def init_params(key, in_channels=3):
    kp = 9 * in_channels
    kp_pad = ((kp + 15) // 16) * 16                 # 27 -> 32 (bf16 pack align)
    chs = [STEM_CH] + list(BLOCK_CHS) + [HEAD_CH]   # out-channels of the 9 conv+BN layers
    keys = jax.random.split(key, 2 * len(chs) + 2)

    # Folded BN scale/shift per layer; zero outside the real channels so
    # padded channels stay exactly 0 through the whole network.
    scales, shifts = [], []
    for j, c in enumerate(chs):
        s, t = _rand_folded_bn(keys[len(chs) + j], c)
        scales.append(jnp.zeros((C_PAD,), jnp.float32).at[:c].set(s))
        shifts.append(jnp.zeros((C_PAD,), jnp.float32).at[:c].set(t))

    # stem weight [kp_pad, C_PAD]; BN scale folded into the output columns.
    w0 = 0.1 * jax.random.normal(keys[0], (kp, STEM_CH), jnp.float32)
    stem_w = jnp.zeros((kp_pad, C_PAD), jnp.float32).at[:kp, :STEM_CH].set(w0)
    stem_w = stem_w * scales[0][None, :]

    # blocks + head weights, each zero-padded to [C_PAD, C_PAD], scale folded.
    w_stack = []
    c_prev = STEM_CH
    for i, c in enumerate(chs[1:]):
        wi = 0.1 * jax.random.normal(keys[1 + i], (c_prev, c), jnp.float32)
        slab = jnp.zeros((C_PAD, C_PAD), jnp.float32).at[:c_prev, :c].set(wi)
        w_stack.append(slab * scales[1 + i][None, :])
        c_prev = c
    w_stack = jnp.stack(w_stack)                               # [8, C_PAD, C_PAD]
    shifts = jnp.stack(shifts)                                 # [9, C_PAD]

    kcw, kcb = jax.random.split(keys[-1])
    cls_w = 0.1 * jax.random.normal(kcw, (1, HEAD_CH), jnp.float32)
    cls_b = 0.1 * jax.random.normal(kcb, (1,), jnp.float32)

    return {
        "stem_w": stem_w.astype(jnp.bfloat16),
        "w_stack": w_stack.astype(jnp.bfloat16),
        "shifts": shifts,
        "cls_w": cls_w,
        "cls_b": cls_b,
    }


# ----------------------------------------------------------------------------
# Forward pass (mirrors ModelV0.forward: x = encoder(img); return x)
# ----------------------------------------------------------------------------
def model_forward(params, img_nchw, *, tile_m=None):
    x = jnp.transpose(img_nchw, (0, 2, 3, 1))                  # NCHW -> NHWC
    kp_pad = params["stem_w"].shape[0]
    patches = im2col_3x3_s2(x, kp_pad)                         # [B, Ho, Wo, kp_pad] bf16
    B, Ho, Wo, _ = patches.shape
    hw = Ho * Wo
    patches = patches.reshape(B, hw, kp_pad)

    if tile_m is None:
        tile_m = _choose_tile_m(hw)
    n_m = hw // tile_m
    sub_m = _choose_sub_m(tile_m)
    n_sub = tile_m // sub_m
    n_layers = params["w_stack"].shape[0]

    out = pl.pallas_call(
        functools.partial(_fused_backbone_kernel, n_layers=n_layers,
                          inv_hw=1.0 / hw, sub_m=sub_m, n_sub=n_sub),
        out_shape=jax.ShapeDtypeStruct((B, 1, C_PAD), jnp.float32),
        grid=(B, n_m),
        in_specs=[
            pl.BlockSpec((None, tile_m, kp_pad), lambda b, m: (b, m, 0)),        # im2col tile
            pl.BlockSpec((kp_pad, C_PAD), lambda b, m: (0, 0)),                  # stem weight
            pl.BlockSpec((n_layers, C_PAD, C_PAD), lambda b, m: (0, 0, 0)),      # block/head weights
            pl.BlockSpec((n_layers + 1, C_PAD), lambda b, m: (0, 0)),            # folded BN shifts
            pl.BlockSpec((1, C_PAD), lambda b, m: (0, 0)),                       # classifier weight
            pl.BlockSpec(memory_space=pltpu.MemorySpace.SMEM),                   # classifier bias
        ],
        out_specs=pl.BlockSpec((None, 1, C_PAD), lambda b, m: (b, 0, 0)),
        compiler_params=pltpu.CompilerParams(
            dimension_semantics=("parallel", "arbitrary")),
    )(patches, params["stem_w"], params["w_stack"], params["shifts"],
      params["cls_w"], params["cls_b"])

    return out[:, 0, :1]                                       # [B, 1] logits


if __name__ == "__main__":
    key = jax.random.PRNGKey(0)
    k_img, k_par = jax.random.split(key)

    B, C_in, H, W = 2, 3, 16, 16
    img = jax.random.normal(k_img, (B, C_in, H, W), dtype=jnp.float32)  # NCHW input
    params = init_params(k_par, in_channels=C_in)

    fwd = jax.jit(lambda im: model_forward(params, im))
    logits = fwd(img)
    jax.block_until_ready(logits)

    assert logits.shape == (B, 1)
    assert bool(jnp.all(jnp.isfinite(logits)))
    print("KERNEL_OK")
</pallas_src>

<mosaic_0001>
module attributes {stable_mosaic.version = 11 : i64} {
  func.func @_fused_backbone_kernel(%arg0: i32, %arg1: i32, %arg2: memref<1x64x32xbf16, #tpu.memory_space<vmem>>, %arg3: memref<32x128xbf16, #tpu.memory_space<vmem>>, %arg4: memref<8x128x128xbf16, #tpu.memory_space<vmem>>, %arg5: memref<9x128xf32, #tpu.memory_space<vmem>>, %arg6: memref<1x128xf32, #tpu.memory_space<vmem>>, %arg7: memref<1xf32, #tpu.memory_space<smem>>, %arg8: memref<1x1x128xf32, #tpu.memory_space<vmem>>) attributes {dimension_semantics = [#tpu.dimension_semantics<parallel>, #tpu.dimension_semantics<arbitrary>], iteration_bounds = array<i64: 2, 1>, scalar_prefetch = 0 : i64, scratch_operands = 0 : i64, tpu.core_type = #tpu.core_type<tc>, window_params = [{transform_indices = @transform_0, window_bounds = array<i64: 1, 64, 32>}, {pipeline_mode = #tpu.pipeline_mode<synchronous>, transform_indices = @transform_1, window_bounds = array<i64: 32, 128>}, {pipeline_mode = #tpu.pipeline_mode<synchronous>, transform_indices = @transform_2, window_bounds = array<i64: 8, 128, 128>}, {pipeline_mode = #tpu.pipeline_mode<synchronous>, transform_indices = @transform_3, window_bounds = array<i64: 9, 128>}, {pipeline_mode = #tpu.pipeline_mode<synchronous>, transform_indices = @transform_4, window_bounds = array<i64: 1, 128>}, {transform_indices = @transform_5, window_bounds = array<i64: 1>}, {transform_indices = @transform_6, window_bounds = array<i64: 1, 1, 128>}]} {
    %c0_i32 = arith.constant 0 : i32
    %0 = arith.cmpi eq, %arg1, %c0_i32 : i32
    %1 = arith.extui %0 : i1 to i32
    %c0_i32_0 = arith.constant 0 : i32
    %2 = arith.cmpi ne, %1, %c0_i32_0 : i32
    scf.if %2 {
      %cst_74 = arith.constant 0.000000e+00 : f32
      %158 = vector.broadcast %cst_74 : f32 to vector<1x128xf32>
      %c0_75 = arith.constant 0 : index
      %c0_76 = arith.constant 0 : index
      %c0_77 = arith.constant 0 : index
      %159 = vector.load %arg8[%c0_75, %c0_76, %c0_77] : memref<1x1x128xf32, #tpu.memory_space<vmem>>, vector<1x1x128xf32>
      %160 = vector.shape_cast %159 : vector<1x1x128xf32> to vector<1x128xf32>
      %161 = vector.shape_cast %158 : vector<1x128xf32> to vector<1x1x128xf32>
      tpu.vector_store %arg8[%c0_75, %c0_76, %c0_77], %161 {strides = array<i32>} : memref<1x1x128xf32, #tpu.memory_space<vmem>>, vector<1x1x128xf32>,
    } else {
    }
    %c0 = arith.constant 0 : index
    %c0_1 = arith.constant 0 : index
    %c0_2 = arith.constant 0 : index
    %3 = vector.load %arg2[%c0, %c0_1, %c0_2] : memref<1x64x32xbf16, #tpu.memory_space<vmem>>, vector<1x64x32xbf16>
    %4 = vector.shape_cast %3 : vector<1x64x32xbf16> to vector<64x32xbf16>
    %c0_3 = arith.constant 0 : index
    %c0_4 = arith.constant 0 : index
    %5 = vector.load %arg3[%c0_3, %c0_4] : memref<32x128xbf16, #tpu.memory_space<vmem>>, vector<32x128xbf16>
    %cst = arith.constant dense<0.000000e+00> : vector<64x128xf32>
    %6 = tpu.matmul %4, %5, %cst {dimension_numbers = #tpu.dot_dimension_numbers<[1], [0], [0], [1], [0, 0, 1, 1], [], []>} : vector<64x32xbf16>, vector<32x128xbf16>, vector<64x128xf32> -> vector<64x128xf32>
    %c0_5 = arith.constant 0 : index
    %c0_6 = arith.constant 0 : index
    %7 = vector.load %arg5[%c0_5, %c0_6] : memref<9x128xf32, #tpu.memory_space<vmem>>, vector<1x128xf32>
    %8 = vector.shape_cast %7 : vector<1x128xf32> to vector<128xf32>
    %9 = vector.shape_cast %8 : vector<128xf32> to vector<1x128xf32>
    %10 = vector.broadcast %9 : vector<1x128xf32> to vector<64x128xf32>
    %11 = arith.addf %6, %10 : vector<64x128xf32>
    %cst_7 = arith.constant 0.000000e+00 : f32
    %12 = vector.broadcast %cst_7 : f32 to vector<64x128xf32>
    %13 = arith.subf %12, %11 : vector<64x128xf32>
    %14 = math.exp %13 : vector<64x128xf32>
    %cst_8 = arith.constant 1.000000e+00 : f32
    %15 = vector.broadcast %cst_8 : f32 to vector<64x128xf32>
    %16 = arith.addf %15, %14 : vector<64x128xf32>
    %17 = tpu.reciprocal %16 {approx = true} : vector<64x128xf32> -> vector<64x128xf32>
    %18 = arith.mulf %11, %17 : vector<64x128xf32>
    %19 = arith.truncf %18 : vector<64x128xf32> to vector<64x128xbf16>
    %c0_9 = arith.constant 0 : index
    %c0_10 = arith.constant 0 : index
    %c0_11 = arith.constant 0 : index
    %20 = vector.load %arg4[%c0_9, %c0_10, %c0_11] : memref<8x128x128xbf16, #tpu.memory_space<vmem>>, vector<1x128x128xbf16>
    %21 = vector.shape_cast %20 : vector<1x128x128xbf16> to vector<128x128xbf16>
    %cst_12 = arith.constant dense<0.000000e+00> : vector<64x128xf32>
    %22 = tpu.matmul %19, %21, %cst_12 {dimension_numbers = #tpu.dot_dimension_numbers<[1], [0], [0], [1], [0, 0, 1, 1], [], []>} : vector<64x128xbf16>, vector<128x128xbf16>, vector<64x128xf32> -> vector<64x128xf32>
    %c1 = arith.constant 1 : index
    %c0_13 = arith.constant 0 : index
    %23 = vector.load %arg5[%c1, %c0_13] : memref<9x128xf32, #tpu.memory_space<vmem>>, vector<1x128xf32>
    %24 = vector.shape_cast %23 : vector<1x128xf32> to vector<128xf32>
    %25 = vector.shape_cast %24 : vector<128xf32> to vector<1x128xf32>
    %26 = vector.broadcast %25 : vector<1x128xf32> to vector<64x128xf32>
    %27 = arith.addf %22, %26 : vector<64x128xf32>
    %cst_14 = arith.constant 0.000000e+00 : f32
    %28 = vector.broadcast %cst_14 : f32 to vector<64x128xf32>
    %29 = arith.subf %28, %27 : vector<64x128xf32>
    %30 = math.exp %29 : vector<64x128xf32>
    %cst_15 = arith.constant 1.000000e+00 : f32
    %31 = vector.broadcast %cst_15 : f32 to vector<64x128xf32>
    %32 = arith.addf %31, %30 : vector<64x128xf32>
    %33 = tpu.reciprocal %32 {approx = true} : vector<64x128xf32> -> vector<64x128xf32>
    %34 = arith.mulf %27, %33 : vector<64x128xf32>
    %35 = arith.truncf %34 : vector<64x128xf32> to vector<64x128xbf16>
    %c1_16 = arith.constant 1 : index
    %c0_17 = arith.constant 0 : index
    %c0_18 = arith.constant 0 : index
    %36 = vector.load %arg4[%c1_16, %c0_17, %c0_18] : memref<8x128x128xbf16, #tpu.memory_space<vmem>>, vector<1x128x128xbf16>
    %37 = vector.shape_cast %36 : vector<1x128x128xbf16> to vector<128x128xbf16>
    %cst_19 = arith.constant dense<0.000000e+00> : vector<64x128xf32>
    %38 = tpu.matmul %35, %37, %cst_19 {dimension_numbers = #tpu.dot_dimension_numbers<[1], [0], [0], [1], [0, 0, 1, 1], [], []>} : vector<64x128xbf16>, vector<128x128xbf16>, vector<64x128xf32> -> vector<64x128xf32>
    %c2 = arith.constant 2 : index
    %c0_20 = arith.constant 0 : index
    %39 = vector.load %arg5[%c2, %c0_20] : memref<9x128xf32, #tpu.memory_space<vmem>>, vector<1x128xf32>
    %40 = vector.shape_cast %39 : vector<1x128xf32> to vector<128xf32>
    %41 = vector.shape_cast %40 : vector<128xf32> to vector<1x128xf32>
    %42 = vector.broadcast %41 : vector<1x128xf32> to vector<64x128xf32>
    %43 = arith.addf %38, %42 : vector<64x128xf32>
    %cst_21 = arith.constant 0.000000e+00 : f32
    %44 = vector.broadcast %cst_21 : f32 to vector<64x128xf32>
    %45 = arith.subf %44, %43 : vector<64x128xf32>
    %46 = math.exp %45 : vector<64x128xf32>
    %cst_22 = arith.constant 1.000000e+00 : f32
    %47 = vector.broadcast %cst_22 : f32 to vector<64x128xf32>
    %48 = arith.addf %47, %46 : vector<64x128xf32>
    %49 = tpu.reciprocal %48 {approx = true} : vector<64x128xf32> -> vector<64x128xf32>
    %50 = arith.mulf %43, %49 : vector<64x128xf32>
    %51 = arith.truncf %50 : vector<64x128xf32> to vector<64x128xbf16>
    %c2_23 = arith.constant 2 : index
    %c0_24 = arith.constant 0 : index
    %c0_25 = arith.constant 0 : index
    %52 = vector.load %arg4[%c2_23, %c0_24, %c0_25] : memref<8x128x128xbf16, #tpu.memory_space<vmem>>, vector<1x128x128xbf16>
    %53 = vector.shape_cast %52 : vector<1x128x128xbf16> to vector<128x128xbf16>
    %cst_26 = arith.constant dense<0.000000e+00> : vector<64x128xf32>
    %54 = tpu.matmul %51, %53, %cst_26 {dimension_numbers = #tpu.dot_dimension_numbers<[1], [0], [0], [1], [0, 0, 1, 1], [], []>} : vector<64x128xbf16>, vector<128x128xbf16>, vector<64x128xf32> -> vector<64x128xf32>
    %c3 = arith.constant 3 : index
    %c0_27 = arith.constant 0 : index
    %55 = vector.load %arg5[%c3, %c0_27] : memref<9x128xf32, #tpu.memory_space<vmem>>, vector<1x128xf32>
    %56 = vector.shape_cast %55 : vector<1x128xf32> to vector<128xf32>
    %57 = vector.shape_cast %56 : vector<128xf32> to vector<1x128xf32>
    %58 = vector.broadcast %57 : vector<1x128xf32> to vector<64x128xf32>
    %59 = arith.addf %54, %58 : vector<64x128xf32>
    %cst_28 = arith.constant 0.000000e+00 : f32
    %60 = vector.broadcast %cst_28 : f32 to vector<64x128xf32>
    %61 = arith.subf %60, %59 : vector<64x128xf32>
    %62 = math.exp %61 : vector<64x128xf32>
    %cst_29 = arith.constant 1.000000e+00 : f32
    %63 = vector.broadcast %cst_29 : f32 to vector<64x128xf32>
    %64 = arith.addf %63, %62 : vector<64x128xf32>
    %65 = tpu.reciprocal %64 {approx = true} : vector<64x128xf32> -> vector<64x128xf32>
    %66 = arith.mulf %59, %65 : vector<64x128xf32>
    %67 = arith.truncf %66 : vector<64x128xf32> to vector<64x128xbf16>
    %c3_30 = arith.constant 3 : index
    %c0_31 = arith.constant 0 : index
    %c0_32 = arith.constant 0 : index
    %68 = vector.load %arg4[%c3_30, %c0_31, %c0_32] : memref<8x128x128xbf16, #tpu.memory_space<vmem>>, vector<1x128x128xbf16>
    %69 = vector.shape_cast %68 : vector<1x128x128xbf16> to vector<128x128xbf16>
    %cst_33 = arith.constant dense<0.000000e+00> : vector<64x128xf32>
    %70 = tpu.matmul %67, %69, %cst_33 {dimension_numbers = #tpu.dot_dimension_numbers<[1], [0], [0], [1], [0, 0, 1, 1], [], []>} : vector<64x128xbf16>, vector<128x128xbf16>, vector<64x128xf32> -> vector<64x128xf32>
    %c4 = arith.constant 4 : index
    %c0_34 = arith.constant 0 : index
    %71 = vector.load %arg5[%c4, %c0_34] : memref<9x128xf32, #tpu.memory_space<vmem>>, vector<1x128xf32>
    %72 = vector.shape_cast %71 : vector<1x128xf32> to vector<128xf32>
    %73 = vector.shape_cast %72 : vector<128xf32> to vector<1x128xf32>
    %74 = vector.broadcast %73 : vector<1x128xf32> to vector<64x128xf32>
    %75 = arith.addf %70, %74 : vector<64x128xf32>
    %cst_35 = arith.constant 0.000000e+00 : f32
    %76 = vector.broadcast %cst_35 : f32 to vector<64x128xf32>
    %77 = arith.subf %76, %75 : vector<64x128xf32>
    %78 = math.exp %77 : vector<64x128xf32>
    %cst_36 = arith.constant 1.000000e+00 : f32
    %79 = vector.broadcast %cst_36 : f32 to vector<64x128xf32>
    %80 = arith.addf %79, %78 : vector<64x128xf32>
    %81 = tpu.reciprocal %80 {approx = true} : vector<64x128xf32> -> vector<64x128xf32>
    %82 = arith.mulf %75, %81 : vector<64x128xf32>
    %83 = arith.truncf %82 : vector<64x128xf32> to vector<64x128xbf16>
    %c4_37 = arith.constant 4 : index
    %c0_38 = arith.constant 0 : index
    %c0_39 = arith.constant 0 : index
    %84 = vector.load %arg4[%c4_37, %c0_38, %c0_39] : memref<8x128x128xbf16, #tpu.memory_space<vmem>>, vector<1x128x128xbf16>
    %85 = vector.shape_cast %84 : vector<1x128x128xbf16> to vector<128x128xbf16>
    %cst_40 = arith.constant dense<0.000000e+00> : vector<64x128xf32>
    %86 = tpu.matmul %83, %85, %cst_40 {dimension_numbers = #tpu.dot_dimension_numbers<[1], [0], [0], [1], [0, 0, 1, 1], [], []>} : vector<64x128xbf16>, vector<128x128xbf16>, vector<64x128xf32> -> vector<64x128xf32>
    %c5 = arith.constant 5 : index
    %c0_41 = arith.constant 0 : index
    %87 = vector.load %arg5[%c5, %c0_41] : memref<9x128xf32, #tpu.memory_space<vmem>>, vector<1x128xf32>
    %88 = vector.shape_cast %87 : vector<1x128xf32> to vector<128xf32>
    %89 = vector.shape_cast %88 : vector<128xf32> to vector<1x128xf32>
    %90 = vector.broadcast %89 : vector<1x128xf32> to vector<64x128xf32>
    %91 = arith.addf %86, %90 : vector<64x128xf32>
    %cst_42 = arith.constant 0.000000e+00 : f32
    %92 = vector.broadcast %cst_42 : f32 to vector<64x128xf32>
    %93 = arith.subf %92, %91 : vector<64x128xf32>
    %94 = math.exp %93 : vector<64x128xf32>
    %cst_43 = arith.constant 1.000000e+00 : f32
    %95 = vector.broadcast %cst_43 : f32 to vector<64x128xf32>
    %96 = arith.addf %95, %94 : vector<64x128xf32>
    %97 = tpu.reciprocal %96 {approx = true} : vector<64x128xf32> -> vector<64x128xf32>
    %98 = arith.mulf %91, %97 : vector<64x128xf32>
    %99 = arith.truncf %98 : vector<64x128xf32> to vector<64x128xbf16>
    %c5_44 = arith.constant 5 : index
    %c0_45 = arith.constant 0 : index
    %c0_46 = arith.constant 0 : index
    %100 = vector.load %arg4[%c5_44, %c0_45, %c0_46] : memref<8x128x128xbf16, #tpu.memory_space<vmem>>, vector<1x128x128xbf16>
    %101 = vector.shape_cast %100 : vector<1x128x128xbf16> to vector<128x128xbf16>
    %cst_47 = arith.constant dense<0.000000e+00> : vector<64x128xf32>
    %102 = tpu.matmul %99, %101, %cst_47 {dimension_numbers = #tpu.dot_dimension_numbers<[1], [0], [0], [1], [0, 0, 1, 1], [], []>} : vector<64x128xbf16>, vector<128x128xbf16>, vector<64x128xf32> -> vector<64x128xf32>
    %c6 = arith.constant 6 : index
    %c0_48 = arith.constant 0 : index
    %103 = vector.load %arg5[%c6, %c0_48] : memref<9x128xf32, #tpu.memory_space<vmem>>, vector<1x128xf32>
    %104 = vector.shape_cast %103 : vector<1x128xf32> to vector<128xf32>
    %105 = vector.shape_cast %104 : vector<128xf32> to vector<1x128xf32>
    %106 = vector.broadcast %105 : vector<1x128xf32> to vector<64x128xf32>
    %107 = arith.addf %102, %106 : vector<64x128xf32>
    %cst_49 = arith.constant 0.000000e+00 : f32
    %108 = vector.broadcast %cst_49 : f32 to vector<64x128xf32>
    %109 = arith.subf %108, %107 : vector<64x128xf32>
    %110 = math.exp %109 : vector<64x128xf32>
    %cst_50 = arith.constant 1.000000e+00 : f32
    %111 = vector.broadcast %cst_50 : f32 to vector<64x128xf32>
    %112 = arith.addf %111, %110 : vector<64x128xf32>
    %113 = tpu.reciprocal %112 {approx = true} : vector<64x128xf32> -> vector<64x128xf32>
    %114 = arith.mulf %107, %113 : vector<64x128xf32>
    %115 = arith.truncf %114 : vector<64x128xf32> to vector<64x128xbf16>
    %c6_51 = arith.constant 6 : index
    %c0_52 = arith.constant 0 : index
    %c0_53 = arith.constant 0 : index
    %116 = vector.load %arg4[%c6_51, %c0_52, %c0_53] : memref<8x128x128xbf16, #tpu.memory_space<vmem>>, vector<1x128x128xbf16>
    %117 = vector.shape_cast %116 : vector<1x128x128xbf16> to vector<128x128xbf16>
    %cst_54 = arith.constant dense<0.000000e+00> : vector<64x128xf32>
    %118 = tpu.matmul %115, %117, %cst_54 {dimension_numbers = #tpu.dot_dimension_numbers<[1], [0], [0], [1], [0, 0, 1, 1], [], []>} : vector<64x128xbf16>, vector<128x128xbf16>, vector<64x128xf32> -> vector<64x128xf32>
    %c7 = arith.constant 7 : index
    %c0_55 = arith.constant 0 : index
    %119 = vector.load %arg5[%c7, %c0_55] : memref<9x128xf32, #tpu.memory_space<vmem>>, vector<1x128xf32>
    %120 = vector.shape_cast %119 : vector<1x128xf32> to vector<128xf32>
    %121 = vector.shape_cast %120 : vector<128xf32> to vector<1x128xf32>
    %122 = vector.broadcast %121 : vector<1x128xf32> to vector<64x128xf32>
    %123 = arith.addf %118, %122 : vector<64x128xf32>
    %cst_56 = arith.constant 0.000000e+00 : f32
    %124 = vector.broadcast %cst_56 : f32 to vector<64x128xf32>
    %125 = arith.subf %124, %123 : vector<64x128xf32>
    %126 = math.exp %125 : vector<64x128xf32>
    %cst_57 = arith.constant 1.000000e+00 : f32
    %127 = vector.broadcast %cst_57 : f32 to vector<64x128xf32>
    %128 = arith.addf %127, %126 : vector<64x128xf32>
    %129 = tpu.reciprocal %128 {approx = true} : vector<64x128xf32> -> vector<64x128xf32>
    %130 = arith.mulf %123, %129 : vector<64x128xf32>
    %131 = arith.truncf %130 : vector<64x128xf32> to vector<64x128xbf16>
    %c7_58 = arith.constant 7 : index
    %c0_59 = arith.constant 0 : index
    %c0_60 = arith.constant 0 : index
    %132 = vector.load %arg4[%c7_58, %c0_59, %c0_60] : memref<8x128x128xbf16, #tpu.memory_space<vmem>>, vector<1x128x128xbf16>
    %133 = vector.shape_cast %132 : vector<1x128x128xbf16> to vector<128x128xbf16>
    %cst_61 = arith.constant dense<0.000000e+00> : vector<64x128xf32>
    %134 = tpu.matmul %131, %133, %cst_61 {dimension_numbers = #tpu.dot_dimension_numbers<[1], [0], [0], [1], [0, 0, 1, 1], [], []>} : vector<64x128xbf16>, vector<128x128xbf16>, vector<64x128xf32> -> vector<64x128xf32>
    %c8 = arith.constant 8 : index
    %c0_62 = arith.constant 0 : index
    %135 = vector.load %arg5[%c8, %c0_62] : memref<9x128xf32, #tpu.memory_space<vmem>>, vector<1x128xf32>
    %136 = vector.shape_cast %135 : vector<1x128xf32> to vector<128xf32>
    %137 = vector.shape_cast %136 : vector<128xf32> to vector<1x128xf32>
    %138 = vector.broadcast %137 : vector<1x128xf32> to vector<64x128xf32>
    %139 = arith.addf %134, %138 : vector<64x128xf32>
    %cst_63 = arith.constant 0.000000e+00 : f32
    %140 = vector.broadcast %cst_63 : f32 to vector<64x128xf32>
    %141 = arith.subf %140, %139 : vector<64x128xf32>
    %142 = math.exp %141 : vector<64x128xf32>
    %cst_64 = arith.constant 1.000000e+00 : f32
    %143 = vector.broadcast %cst_64 : f32 to vector<64x128xf32>
    %144 = arith.addf %143, %142 : vector<64x128xf32>
    %145 = tpu.reciprocal %144 {approx = true} : vector<64x128xf32> -> vector<64x128xf32>
    %146 = arith.mulf %139, %145 : vector<64x128xf32>
    %c0_65 = arith.constant 0 : index
    %c0_66 = arith.constant 0 : index
    %c0_67 = arith.constant 0 : index
    %147 = vector.load %arg8[%c0_65, %c0_66, %c0_67] : memref<1x1x128xf32, #tpu.memory_space<vmem>>, vector<1x1x128xf32>
    %148 = vector.shape_cast %147 : vector<1x1x128xf32> to vector<1x128xf32>
    %cst_68 = arith.constant dense<0.000000e+00> : vector<128xf32>
    %149 = vector.multi_reduction <add>, %146, %cst_68 [0] : vector<64x128xf32> to vector<128xf32>
    %150 = vector.shape_cast %149 : vector<128xf32> to vector<1x128xf32>
    %151 = arith.addf %148, %150 : vector<1x128xf32>
    %c0_69 = arith.constant 0 : index
    %c0_70 = arith.constant 0 : index
    %c0_71 = arith.constant 0 : index
    %152 = vector.load %arg8[%c0_69, %c0_70, %c0_71] : memref<1x1x128xf32, #tpu.memory_space<vmem>>, vector<1x1x128xf32>
    %153 = vector.shape_cast %152 : vector<1x1x128xf32> to vector<1x128xf32>
    %154 = vector.shape_cast %151 : vector<1x128xf32> to vector<1x1x128xf32>
    tpu.vector_store %arg8[%c0_69, %c0_70, %c0_71], %154 {strides = array<i32>} : memref<1x1x128xf32, #tpu.memory_space<vmem>>, vector<1x1x128xf32>,
    %c0_i32_72 = arith.constant 0 : i32
    %155 = arith.cmpi eq, %arg1, %c0_i32_72 : i32
    %156 = arith.extui %155 : i1 to i32
    %c0_i32_73 = arith.constant 0 : i32
    %157 = arith.cmpi ne, %156, %c0_i32_73 : i32
    scf.if %157 {
      %c0_74 = arith.constant 0 : index
      %c0_75 = arith.constant 0 : index
      %c0_76 = arith.constant 0 : index
      %158 = vector.load %arg8[%c0_74, %c0_75, %c0_76] : memref<1x1x128xf32, #tpu.memory_space<vmem>>, vector<1x1x128xf32>
      %159 = vector.shape_cast %158 : vector<1x1x128xf32> to vector<1x128xf32>
      %cst_77 = arith.constant 1.562500e-02 : f32
      %160 = vector.broadcast %cst_77 : f32 to vector<1x128xf32>
      %161 = arith.mulf %159, %160 : vector<1x128xf32>
      %c0_78 = arith.constant 0 : index
      %c0_79 = arith.constant 0 : index
      %162 = vector.load %arg6[%c0_78, %c0_79] : memref<1x128xf32, #tpu.memory_space<vmem>>, vector<1x128xf32>
      %163 = arith.mulf %161, %162 : vector<1x128xf32>
      %cst_80 = arith.constant dense<0.000000e+00> : vector<1xf32>
      %164 = vector.multi_reduction <add>, %163, %cst_80 [1] : vector<1x128xf32> to vector<1xf32>
      %165 = vector.shape_cast %164 : vector<1xf32> to vector<1x1xf32>
      %c0_81 = arith.constant 0 : index
      %166 = memref.load %arg7[%c0_81] : memref<1xf32, #tpu.memory_space<smem>>
      %167 = vector.broadcast %166 : f32 to vector<1x1xf32>
      %168 = arith.addf %165, %167 : vector<1x1xf32>
      %169 = vector.shape_cast %168 : vector<1x1xf32> to vector<1x1xf32>
      %170 = vector.broadcast %169 : vector<1x1xf32> to vector<1x128xf32>
      %c0_82 = arith.constant 0 : index
      %c0_83 = arith.constant 0 : index
      %c0_84 = arith.constant 0 : index
      %171 = vector.load %arg8[%c0_82, %c0_83, %c0_84] : memref<1x1x128xf32, #tpu.memory_space<vmem>>, vector<1x1x128xf32>
      %172 = vector.shape_cast %171 : vector<1x1x128xf32> to vector<1x128xf32>
      %173 = vector.shape_cast %170 : vector<1x128xf32> to vector<1x1x128xf32>
      tpu.vector_store %arg8[%c0_82, %c0_83, %c0_84], %173 {strides = array<i32>} : memref<1x1x128xf32, #tpu.memory_space<vmem>>, vector<1x1x128xf32>,
    } else {
    }
    return
  }
  func.func @transform_0(%arg0: i32, %arg1: i32) -> (i32, i32, i32) {
    %c0_i32 = arith.constant 0 : i32
    %c0_i32_0 = arith.constant 0 : i32
    return %arg0, %arg1, %c0_i32 : i32, i32, i32
  }
  func.func @transform_1(%arg0: i32, %arg1: i32) -> (i32, i32) {
    %c0_i32 = arith.constant 0 : i32
    %c0_i32_0 = arith.constant 0 : i32
    %c0_i32_1 = arith.constant 0 : i32
    return %c0_i32, %c0_i32_0 : i32, i32
  }
  func.func @transform_2(%arg0: i32, %arg1: i32) -> (i32, i32, i32) {
    %c0_i32 = arith.constant 0 : i32
    %c0_i32_0 = arith.constant 0 : i32
    %c0_i32_1 = arith.constant 0 : i32
    %c0_i32_2 = arith.constant 0 : i32
    return %c0_i32, %c0_i32_0, %c0_i32_1 : i32, i32, i32
  }
  func.func @transform_3(%arg0: i32, %arg1: i32) -> (i32, i32) {
    %c0_i32 = arith.constant 0 : i32
    %c0_i32_0 = arith.constant 0 : i32
    %c0_i32_1 = arith.constant 0 : i32
    return %c0_i32, %c0_i32_0 : i32, i32
  }
  func.func @transform_4(%arg0: i32, %arg1: i32) -> (i32, i32) {
    %c0_i32 = arith.constant 0 : i32
    %c0_i32_0 = arith.constant 0 : i32
    %c0_i32_1 = arith.constant 0 : i32
    return %c0_i32, %c0_i32_0 : i32, i32
  }
  func.func @transform_5(%arg0: i32, %arg1: i32) -> i32 {
    %c0_i32 = arith.constant 0 : i32
    %c0_i32_0 = arith.constant 0 : i32
    return %c0_i32 : i32
  }
  func.func @transform_6(%arg0: i32, %arg1: i32) -> (i32, i32, i32) {
    %c0_i32 = arith.constant 0 : i32
    %c0_i32_0 = arith.constant 0 : i32
    %c0_i32_1 = arith.constant 0 : i32
    return %arg0, %c0_i32, %c0_i32_0 : i32, i32, i32
  }
}

</mosaic_0001>

<bundles_post_ra>
// kernel: _lambda_.1
= control target key start
LH: loop header
LB: loop body
LE: loop exit
PB: predicated region body
PF: predicated region fallthrough
CT: control target
= control target key end

     0   :  { %s2557_s23 = smov 0   ;;  %s2559_s24 = smov 0   ;;  %s2919_s0 = inlined_call_operand.vmem [shape: bf16[2,64,32], index: 0, kind: input, shape index: {}]   ;;  %s2920_s1 = inlined_call_operand.vmem [shape: bf16[32,128], index: 1, kind: input, shape index: {}]   ;;  %s2921_s2 = inlined_call_operand.vmem [shape: bf16[8,128,128], index: 2, kind: input, shape index: {}]   ;;  %s2922_s3 = inlined_call_operand.vmem [shape: f32[9,128], index: 3, kind: input, shape index: {}]   ;;  %s2923_s4 = inlined_call_operand.vmem [shape: f32[1,128], index: 4, kind: input, shape index: {}]   ;;  %s2924_s5 = inlined_call_operand.<no memory space> [shape: f32[1], index: 5, kind: input, shape index: {}]   ;;  %s2925_s6 = inlined_call_operand.vmem [shape: f32[2,1,128], index: 6, kind: output, shape index: {}]  }
   0x1   :  { %11 = sst [smem:[#allocation2]] %s2924_s5  ;;  %s2561_s25 = smov 0  }
   0x2 LB: > { %s29_s5 = sadd.s32 1, %s2512_s24  ;;  %p1698_p0 = scmp.ge.s32.totalorder %s2516_s25, 1  ;;  %s2516_s25 = sphi %s2561_s25, %s17_s25   ;;  %s2512_s24 = sphi %s2559_s24, %s2927_s24   ;;  %s2508_s23 = sphi %s2557_s23, %s2926_s23  }
   0x3   : > { %p31_p1 = scmp.ge.s32.totalorder %s29_s5, 2  ;;  %p232_p2 = scmp.lt.s32.totalorder %s2516_s25, 3 }
   0x5   : > { %s2929_s5 = smov (%p31_p1, %s29_s5), 0  ;;  %p233_p3 = pnand %p1698_p0, %p232_p2 }
   0x6   : > { %p265_p4 = scmp.lt.s32.totalorder (!%p233_p3), %s2508_s23, 1  ;;  %s1629_s13 = sld [smem:[#allocation2]] (!%p233_p3) }
   0x7   : > { %236 = sbr.rel (%p233_p3) target bundleno = 1678 (0x68e), region = 44 }
   0xc   : > { %v2105_v0 = vld [vmem:[%s2920_s1 + $0x8] sm:$0xff]  ;;  %v2104_v1 = vld [vmem:[%s2920_s1] sm:$0xff]  ;;  %s2931_s23 = smov (!%p265_p4, %s2508_s23), 1  ;;  %vm329_vm0 = vcmask 261120   ;;  %v2113_v6 = vld [vmem:[%s2921_s2 + $0x38] sm:$0xff]  ;;  %vm1625_vm1 = vcmask 1040384  }
   0xd   : > { %348 = vmatpush.bf16.msra.mxu0 %v2105_v0  ;;  %2170 = vmatpush.bf16.msra.mxu1 %v2105_v0  ;;  %s2099_s30 = sshll.u32 %s2931_s23, 5  ;;  %v2112_v7 = vld [vmem:[%s2921_s2 + $0x30] sm:$0xff]  ;;  %v2111_v8 = vld [vmem:[%s2921_s2 + $0x28] sm:$0xff]  ;;  %v2110_v9 = vld [vmem:[%s2921_s2 + $0x20] sm:$0xff]  ;;  %s2895_s11 = scalar_lea.vmem %s2925_s6, %s2931_s23 }
   0xe   : > { %s272_s9 = scalar_lea.vmem %s2919_s0, %s2099_s30  ;;  %v2109_v10 = vld [vmem:[%s2921_s2 + $0x18] sm:$0xff]  ;;  %v2108_v11 = vld [vmem:[%s2921_s2 + $0x10] sm:$0xff]  ;;  %v2107_v12 = vld [vmem:[%s2921_s2 + $0x8] sm:$0xff] }
   0xf   : > { %v2100_v2 = vld [vmem:[%s272_s9] sm:$0xff]  ;;  %v2102_v3 = vld [vmem:[%s272_s9 + $0x10] sm:$0xff]  ;;  %v2101_v4 = vld [vmem:[%s272_s9 + $0x8] sm:$0xff] }
  0x10   : > { %v2103_v5 = vld [vmem:[%s272_s9 + $0x18] sm:$0xff]  ;;  %v2197_v13 = vld [vmem:[%s2922_s3] ss:$0 sm:$0xff] }
  0x11   : > { %349 = vmatpush.bf16.msra.mxu0 %v2104_v1  ;;  %2171 = vmatpush.bf16.msra.mxu1 %v2104_v1  ;;  %v2106_v14 = vld [vmem:[%s2921_s2] sm:$0xff] }
  0x14   : > { %1725 = vmatmul.msk.bf16.vlgmr.msra.gmra.mxu0 %vm329_vm0, %v2100_v2  ;;  %1727 = vmatmul.msk.bf16.vlgmr.msra.gmra.mxu1 %vm329_vm0, %v2102_v3 }
  0x15   : > { %489 = vmatpush.bf16.msrb.mxu1 %v2113_v6 }
  0x19   : > { %490 = vmatpush.bf16.msrb.mxu1 %v2112_v7 }
  0x1d   : > { %491 = vmatpush.bf16.msrb.mxu1 %v2111_v8 }
  0x21   : > { %492 = vmatpush.bf16.msrb.mxu1 %v2110_v9 }
  0x24   : > { %1726 = vmatmul.msk.bf16.gmra.mxu0 %vm329_vm0, %v2101_v4  ;;  %1728 = vmatmul.msk.bf16.gmra.mxu1 %vm329_vm0, %v2103_v5 }
  0x25   : > { %493 = vmatpush.bf16.msrb.mxu1 %v2109_v10 }
  0x29   : > { %494 = vmatpush.bf16.msrb.mxu1 %v2108_v11 }
  0x2d   : > { %495 = vmatpush.bf16.msrb.mxu1 %v2107_v12 }
  0x31   : > { %496 = vmatpush.bf16.msrb.mxu1 %v2106_v14 }
  0x91   : > { %v351_v15 = vpop.f32.mrf.mxu0  ;;  %v361_v21 = vpop.f32.mrf.mxu1 }
  0x92   : > { %v352_v16 = vadd.f32 %v2197_v13, %v351_v15  ;;  %v362_v34 = vadd.f32 %v2197_v13, %v361_v21  ;;  %v2119_v21 = vld [vmem:[%s2921_s2 + $0x68] sm:$0xff] }
  0x94   : > { %v371_v17 = vsub.f32 0.0, %v352_v16  ;;  %v375_v39 = vsub.f32 0.0, %v362_v34 }
  0x96   : > { %v379_v18 = vmul.f32 1.442695, %v371_v17  ;;  %v387_v47 = vmul.f32 1.442695, %v375_v39 }
  0x98   : > { %2206 = vpow2.f32 %v379_v18 }
  0x99   : > { %v353_v19 = vpop.f32.mrf.mxu0  ;;  %v363_v29 = vpop.f32.mrf.mxu1 }
  0x9a   : > { %v354_v20 = vadd.f32 %v2197_v13, %v353_v19  ;;  %v364_v36 = vadd.f32 %v2197_v13, %v363_v29  ;;  %v2121_v19 = vld [vmem:[%s2921_s2 + $0x78] sm:$0xff] }
  0x9b   : > { %637 = vmatpush.bf16.msra.mxu2 %v2121_v19 }
  0x9c   : > { %v372_v22 = vsub.f32 0.0, %v354_v20  ;;  %v376_v46 = vsub.f32 0.0, %v364_v36 }
  0x9e   : > { %v381_v23 = vmul.f32 1.442695, %v372_v22  ;;  %v2207_v24 = vpop.eup %2206  ;;  %v389_v50 = vmul.f32 1.442695, %v376_v46  ;;  %v2118_v22 = vld [vmem:[%s2921_s2 + $0x60] sm:$0xff] }
  0x9f   : > { %v395_v27 = vadd.f32 1.0, %v2207_v24  ;;  %v2116_v24 = vld [vmem:[%s2921_s2 + $0x50] sm:$0xff] }
  0xa0   : > { %2208 = vpow2.f32 %v381_v23  ;;  %v2117_v23 = vld [vmem:[%s2921_s2 + $0x58] sm:$0xff] }
  0xa1   : > { %v356_v25 = vpop.f32.mrf.mxu0  ;;  %2210 = vrcp.f32 %v395_v27  ;;  %v366_v42 = vpop.f32.mrf.mxu1  ;;  %v2114_v27 = vld [vmem:[%s2921_s2 + $0x40] sm:$0xff] }
  0xa2   : > { %v357_v26 = vadd.f32 %v2197_v13, %v356_v25  ;;  %v367_v54 = vadd.f32 %v2197_v13, %v366_v42  ;;  %v2115_v25 = vld [vmem:[%s2921_s2 + $0x48] sm:$0xff] }
  0xa4   : > { %v373_v28 = vsub.f32 0.0, %v357_v26  ;;  %v377_v60 = vsub.f32 0.0, %v367_v54 }
  0xa6   : > { %v2209_v30 = vpop.eup %2208  ;;  %v383_v31 = vmul.f32 1.442695, %v373_v28  ;;  %v391_v3 = vmul.f32 1.442695, %v377_v60 }
  0xa7   : > { %v396_v32 = vadd.f32 1.0, %v2209_v30  ;;  %v2211_v38 = vpop.eup %2210 }
  0xa8   : > { %v411_v44 = vmul.f32 %v2211_v38, %v352_v16 }
  0xa9   : > { %2212 = vrcp.f32 %v396_v32  ;;  %v358_v33 = vpop.f32.mrf.mxu0  ;;  %v368_v53 = vpop.f32.mrf.mxu1 }
  0xaa   : > { %2214 = vpow2.f32 %v383_v31  ;;  %v359_v35 = vadd.f32 %v2197_v13, %v358_v33  ;;  %v369_v56 = vadd.f32 %v2197_v13, %v368_v53 }
  0xac   : > { %v374_v37 = vsub.f32 0.0, %v359_v35  ;;  %v378_v0 = vsub.f32 0.0, %v369_v56 }
  0xae   : > { %v385_v40 = vmul.f32 1.442695, %v374_v37  ;;  %v393_v4 = vmul.f32 1.442695, %v378_v0 }
  0xaf   : > { %v2213_v41 = vpop.eup %2212 }
  0xb0   : > { %v2215_v43 = vpop.eup %2214  ;;  %v412_v45 = vmul.f32 %v2213_v41, %v354_v20  ;;  %2216 = vpow2.f32 %v385_v40  ;;  %v2120_v20 = vld [vmem:[%s2921_s2 + $0x70] sm:$0xff] }
  0xb1   : > { %v397_v49 = vadd.f32 1.0, %v2215_v43  ;;  %2218 = vpow2.f32 %v387_v47  ;;  %638 = vmatpush.bf16.msra.mxu2 %v2120_v20 }
  0xb2   : > { %v419_v48 = vpack.c.bf16 %v412_v45, %v411_v44 }
  0xb3   : > { %2220 = vrcp.f32 %v397_v49 }
  0xb4   : > { %497 = vmatmul.bf16.vlgmr.msrb.gmra.mxu1 %v419_v48  ;;  %2222 = vpow2.f32 %v389_v50 }
  0xb5   : > { %639 = vmatpush.bf16.msra.mxu2 %v2119_v21 }
  0xb6   : > { %v2217_v51 = vpop.eup %2216 }
  0xb7   : > { %v398_v52 = vadd.f32 1.0, %v2217_v51  ;;  %v2219_v55 = vpop.eup %2218 }
  0xb8   : > { %v399_v61 = vadd.f32 1.0, %v2219_v55 }
  0xb9   : > { %2224 = vrcp.f32 %v398_v52  ;;  %v2221_v57 = vpop.eup %2220  ;;  %640 = vmatpush.bf16.msra.mxu2 %v2118_v22 }
  0xba   : > { %v2223_v58 = vpop.eup %2222  ;;  %v413_v62 = vmul.f32 %v2221_v57, %v357_v26  ;;  %2226 = vrcp.f32 %v399_v61  ;;  %v2638_v26 = vld [vmem:[%s2922_s3 + $0x1] ss:$0 sm:$0xff] }
  0xbb   : > { %v400_v1 = vadd.f32 1.0, %v2223_v58 }
  0xbd   : > { %2228 = vrcp.f32 %v400_v1  ;;  %641 = vmatpush.bf16.msra.mxu2 %v2117_v23 }
  0xbe   : > { %2230 = vpow2.f32 %v391_v3 }
  0xbf   : > { %v2225_v59 = vpop.eup %2224  ;;  %2232 = vpow2.f32 %v393_v4 }
  0xc0   : > { %v414_v63 = vmul.f32 %v2225_v59, %v359_v35  ;;  %v2227_v5 = vpop.eup %2226 }
  0xc1   : > { %v415_v9 = vmul.f32 %v2227_v5, %v362_v34  ;;  %642 = vmatpush.bf16.msra.mxu2 %v2116_v24 }
  0xc2   : > { %v420_v2 = vpack.c.bf16 %v414_v63, %v413_v62 }
  0xc3   : > { %v2229_v6 = vpop.eup %2228 }
  0xc4   : > { %502 = vmatmul.bf16.gmra.mxu1 %v420_v2  ;;  %v2231_v7 = vpop.eup %2230  ;;  %v416_v10 = vmul.f32 %v2229_v6, %v364_v36 }
  0xc5   : > { %v2233_v8 = vpop.eup %2232  ;;  %v401_v11 = vadd.f32 1.0, %v2231_v7  ;;  %643 = vmatpush.bf16.msra.mxu2 %v2115_v25 }
  0xc6   : > { %v402_v12 = vadd.f32 1.0, %v2233_v8  ;;  %v421_v13 = vpack.c.bf16 %v416_v10, %v415_v9 }
  0xc7   : > { %2234 = vrcp.f32 %v401_v11 }
  0xc8   : > { %2236 = vrcp.f32 %v402_v12 }
  0xc9   : > { %644 = vmatpush.bf16.msra.mxu2 %v2114_v27 }
  0xcd   : > { %v2235_v14 = vpop.eup %2234 }
  0xce   : > { %v2237_v15 = vpop.eup %2236  ;;  %v417_v16 = vmul.f32 %v2235_v14, %v367_v54 }
  0xcf   : > { %v418_v17 = vmul.f32 %v2237_v15, %v369_v56 }
  0xd1   : > { %v422_v18 = vpack.c.bf16 %v418_v17, %v417_v16 }
  0xd4   : > { %507 = vmatmul.bf16.gmra.mxu1 %v421_v13 }
  0xe4   : > { %512 = vmatmul.bf16.gmra.mxu1 %v422_v18 }
 0x131   : > { %v498_v28 = vpop.f32.mrf.mxu1 }
 0x132   : > { %v499_v29 = vadd.f32 %v2638_v26, %v498_v28 }
 0x134   : > { %v518_v30 = vsub.f32 0.0, %v499_v29 }
 0x136   : > { %v526_v31 = vmul.f32 1.442695, %v518_v30 }
 0x138   : > { %2238 = vpow2.f32 %v526_v31 }
 0x139   : > { %v500_v32 = vpop.f32.mrf.mxu1 }
 0x13a   : > { %v501_v33 = vadd.f32 %v2638_v26, %v500_v32  ;;  %v2129_v32 = vld [vmem:[%s2921_s2 + $0xb8] sm:$0xff] }
 0x13b   : > { %785 = vmatpush.bf16.msra.mxu3 %v2129_v32 }
 0x13c   : > { %v519_v34 = vsub.f32 0.0, %v501_v33 }
 0x13e   : > { %v528_v35 = vmul.f32 1.442695, %v519_v34  ;;  %v2239_v36 = vpop.eup %2238  ;;  %v2127_v34 = vld [vmem:[%s2921_s2 + $0xa8] sm:$0xff] }
 0x13f   : > { %v542_v39 = vadd.f32 1.0, %v2239_v36  ;;  %v2125_v36 = vld [vmem:[%s2921_s2 + $0x98] sm:$0xff] }
 0x140   : > { %2240 = vpow2.f32 %v528_v35  ;;  %v2126_v35 = vld [vmem:[%s2921_s2 + $0xa0] sm:$0xff] }
 0x141   : > { %v503_v37 = vpop.f32.mrf.mxu1  ;;  %2242 = vrcp.f32 %v542_v39  ;;  %v2675_v39 = vld [vmem:[%s2922_s3 + $0x2] ss:$0 sm:$0xff] }
 0x142   : > { %v504_v38 = vadd.f32 %v2638_v26, %v503_v37  ;;  %v2124_v37 = vld [vmem:[%s2921_s2 + $0x90] sm:$0xff] }
 0x144   : > { %v520_v40 = vsub.f32 0.0, %v504_v38 }
 0x146   : > { %v2241_v41 = vpop.eup %2240  ;;  %v530_v42 = vmul.f32 1.442695, %v520_v40  ;;  %v2122_v40 = vld [vmem:[%s2921_s2 + $0x80] sm:$0xff] }
 0x147   : > { %v543_v43 = vadd.f32 1.0, %v2241_v41  ;;  %v2243_v47 = vpop.eup %2242 }
 0x148   : > { %v558_v51 = vmul.f32 %v2243_v47, %v499_v29 }
 0x149   : > { %2244 = vrcp.f32 %v543_v43  ;;  %v505_v44 = vpop.f32.mrf.mxu1 }
 0x14a   : > { %2246 = vpow2.f32 %v530_v42  ;;  %v506_v45 = vadd.f32 %v2638_v26, %v505_v44 }
 0x14c   : > { %v521_v46 = vsub.f32 0.0, %v506_v45 }
 0x14e   : > { %v532_v48 = vmul.f32 1.442695, %v521_v46 }
 0x14f   : > { %v2245_v49 = vpop.eup %2244 }
 0x150   : > { %v2247_v50 = vpop.eup %2246  ;;  %v559_v52 = vmul.f32 %v2245_v49, %v501_v33  ;;  %2248 = vpow2.f32 %v532_v48  ;;  %v2128_v33 = vld [vmem:[%s2921_s2 + $0xb0] sm:$0xff] }
 0x151   : > { %v508_v53 = vpop.f32.mrf.mxu1  ;;  %v544_v56 = vadd.f32 1.0, %v2247_v50  ;;  %786 = vmatpush.bf16.msra.mxu3 %v2128_v33 }
 0x152   : > { %v509_v54 = vadd.f32 %v2638_v26, %v508_v53  ;;  %v566_v55 = vpack.c.bf16 %v559_v52, %v558_v51 }
 0x153   : > { %2250 = vrcp.f32 %v544_v56 }
 0x154   : > { %v522_v57 = vsub.f32 0.0, %v509_v54  ;;  %645 = vmatmul.bf16.vlgmr.msra.gmra.mxu2 %v566_v55 }
 0x155   : > { %787 = vmatpush.bf16.msra.mxu3 %v2127_v34 }
 0x156   : > { %v2249_v58 = vpop.eup %2248  ;;  %v534_v59 = vmul.f32 1.442695, %v522_v57 }
 0x157   : > { %v545_v60 = vadd.f32 1.0, %v2249_v58 }
 0x159   : > { %2252 = vrcp.f32 %v545_v60  ;;  %v510_v61 = vpop.f32.mrf.mxu1  ;;  %v2251_v0 = vpop.eup %2250  ;;  %788 = vmatpush.bf16.msra.mxu3 %v2126_v35 }
 0x15a   : > { %2254 = vpow2.f32 %v534_v59  ;;  %v511_v62 = vadd.f32 %v2638_v26, %v510_v61  ;;  %v560_v4 = vmul.f32 %v2251_v0, %v504_v38  ;;  %v2123_v38 = vld [vmem:[%s2921_s2 + $0x88] sm:$0xff] }
 0x15c   : > { %v523_v63 = vsub.f32 0.0, %v511_v62 }
 0x15d   : > { %789 = vmatpush.bf16.msra.mxu3 %v2125_v36 }
 0x15e   : > { %v536_v1 = vmul.f32 1.442695, %v523_v63 }
 0x15f   : > { %v2253_v2 = vpop.eup %2252 }
 0x160   : > { %v2255_v3 = vpop.eup %2254  ;;  %v561_v5 = vmul.f32 %v2253_v2, %v506_v45  ;;  %2256 = vpow2.f32 %v536_v1 }
 0x161   : > { %v513_v6 = vpop.f32.mrf.mxu1  ;;  %v546_v9 = vadd.f32 1.0, %v2255_v3  ;;  %790 = vmatpush.bf16.msra.mxu3 %v2124_v37 }
 0x162   : > { %v514_v7 = vadd.f32 %v2638_v26, %v513_v6  ;;  %v567_v8 = vpack.c.bf16 %v561_v5, %v560_v4 }
 0x163   : > { %2258 = vrcp.f32 %v546_v9 }
 0x164   : > { %v524_v10 = vsub.f32 0.0, %v514_v7  ;;  %650 = vmatmul.bf16.gmra.mxu2 %v567_v8 }
 0x165   : > { %791 = vmatpush.bf16.msra.mxu3 %v2123_v38 }
 0x166   : > { %v2257_v11 = vpop.eup %2256  ;;  %v538_v12 = vmul.f32 1.442695, %v524_v10 }
 0x167   : > { %v547_v13 = vadd.f32 1.0, %v2257_v11 }
 0x169   : > { %2260 = vrcp.f32 %v547_v13  ;;  %v515_v14 = vpop.f32.mrf.mxu1  ;;  %v2259_v17 = vpop.eup %2258  ;;  %792 = vmatpush.bf16.msra.mxu3 %v2122_v40 }
 0x16a   : > { %2262 = vpow2.f32 %v538_v12  ;;  %v516_v15 = vadd.f32 %v2638_v26, %v515_v14  ;;  %v562_v21 = vmul.f32 %v2259_v17, %v509_v54 }
 0x16c   : > { %v525_v16 = vsub.f32 0.0, %v516_v15 }
 0x16e   : > { %v540_v18 = vmul.f32 1.442695, %v525_v16 }
 0x16f   : > { %v2261_v19 = vpop.eup %2260 }
 0x170   : > { %v2263_v20 = vpop.eup %2262  ;;  %v563_v22 = vmul.f32 %v2261_v19, %v511_v62  ;;  %2264 = vpow2.f32 %v540_v18 }
 0x171   : > { %v548_v24 = vadd.f32 1.0, %v2263_v20 }
 0x172   : > { %v568_v23 = vpack.c.bf16 %v563_v22, %v562_v21 }
 0x173   : > { %2266 = vrcp.f32 %v548_v24 }
 0x174   : > { %655 = vmatmul.bf16.gmra.mxu2 %v568_v23 }
 0x176   : > { %v2265_v25 = vpop.eup %2264 }
 0x177   : > { %v549_v27 = vadd.f32 1.0, %v2265_v25 }
 0x179   : > { %2268 = vrcp.f32 %v549_v27  ;;  %v2267_v28 = vpop.eup %2266 }
 0x17a   : > { %v564_v30 = vmul.f32 %v2267_v28, %v514_v7 }
 0x17f   : > { %v2269_v29 = vpop.eup %2268 }
 0x180   : > { %v565_v31 = vmul.f32 %v2269_v29, %v516_v15 }
 0x182   : > { %v569_v26 = vpack.c.bf16 %v565_v31, %v564_v30 }
 0x184   : > { %660 = vmatmul.bf16.gmra.mxu2 %v569_v26 }
 0x1d7   : > { %v646_v41 = vpop.f32.mrf.mxu2 }
 0x1d8   : > { %v647_v42 = vadd.f32 %v2675_v39, %v646_v41 }
 0x1da   : > { %v666_v43 = vsub.f32 0.0, %v647_v42 }
 0x1dc   : > { %v674_v44 = vmul.f32 1.442695, %v666_v43 }
 0x1de   : > { %2270 = vpow2.f32 %v674_v44 }
 0x1df   : > { %v648_v45 = vpop.f32.mrf.mxu2 }
 0x1e0   : > { %v649_v46 = vadd.f32 %v2675_v39, %v648_v45  ;;  %v2137_v45 = vld [vmem:[%s2921_s2 + $0xf8] sm:$0xff] }
 0x1e1   : > { %933 = vmatpush.bf16.msrb.mxu0 %v2137_v45 }
 0x1e2   : > { %v667_v47 = vsub.f32 0.0, %v649_v46 }
 0x1e4   : > { %v676_v48 = vmul.f32 1.442695, %v667_v47  ;;  %v2271_v49 = vpop.eup %2270  ;;  %v2135_v47 = vld [vmem:[%s2921_s2 + $0xe8] sm:$0xff] }
 0x1e5   : > { %v690_v52 = vadd.f32 1.0, %v2271_v49  ;;  %v2133_v49 = vld [vmem:[%s2921_s2 + $0xd8] sm:$0xff] }
 0x1e6   : > { %2272 = vpow2.f32 %v676_v48  ;;  %v2134_v48 = vld [vmem:[%s2921_s2 + $0xe0] sm:$0xff] }
 0x1e7   : > { %v651_v50 = vpop.f32.mrf.mxu2  ;;  %2274 = vrcp.f32 %v690_v52  ;;  %v2712_v52 = vld [vmem:[%s2922_s3 + $0x3] ss:$0 sm:$0xff] }
 0x1e8   : > { %v652_v51 = vadd.f32 %v2675_v39, %v651_v50  ;;  %v2132_v50 = vld [vmem:[%s2921_s2 + $0xd0] sm:$0xff] }
 0x1ea   : > { %v668_v53 = vsub.f32 0.0, %v652_v51 }
 0x1ec   : > { %v2273_v54 = vpop.eup %2272  ;;  %v678_v55 = vmul.f32 1.442695, %v668_v53  ;;  %v2130_v53 = vld [vmem:[%s2921_s2 + $0xc0] sm:$0xff] }
 0x1ed   : > { %v691_v56 = vadd.f32 1.0, %v2273_v54  ;;  %v2275_v60 = vpop.eup %2274 }
 0x1ee   : > { %v706_v0 = vmul.f32 %v2275_v60, %v647_v42 }
 0x1ef   : > { %2276 = vrcp.f32 %v691_v56  ;;  %v653_v57 = vpop.f32.mrf.mxu2 }
 0x1f0   : > { %2278 = vpow2.f32 %v678_v55  ;;  %v654_v58 = vadd.f32 %v2675_v39, %v653_v57 }
 0x1f2   : > { %v669_v59 = vsub.f32 0.0, %v654_v58 }
 0x1f4   : > { %v680_v61 = vmul.f32 1.442695, %v669_v59 }
 0x1f5   : > { %v2277_v62 = vpop.eup %2276 }
 0x1f6   : > { %v2279_v63 = vpop.eup %2278  ;;  %v707_v1 = vmul.f32 %v2277_v62, %v649_v46  ;;  %2280 = vpow2.f32 %v680_v61  ;;  %v2136_v46 = vld [vmem:[%s2921_s2 + $0xf0] sm:$0xff] }
 0x1f7   : > { %v656_v2 = vpop.f32.mrf.mxu2  ;;  %v692_v5 = vadd.f32 1.0, %v2279_v63  ;;  %934 = vmatpush.bf16.msrb.mxu0 %v2136_v46 }
 0x1f8   : > { %v657_v3 = vadd.f32 %v2675_v39, %v656_v2  ;;  %v714_v4 = vpack.c.bf16 %v707_v1, %v706_v0 }
 0x1f9   : > { %2282 = vrcp.f32 %v692_v5 }
 0x1fa   : > { %v670_v6 = vsub.f32 0.0, %v657_v3  ;;  %793 = vmatmul.bf16.vlgmr.msra.gmra.mxu3 %v714_v4 }
 0x1fb   : > { %935 = vmatpush.bf16.msrb.mxu0 %v2135_v47 }
 0x1fc   : > { %v2281_v7 = vpop.eup %2280  ;;  %v682_v8 = vmul.f32 1.442695, %v670_v6 }
 0x1fd   : > { %v693_v9 = vadd.f32 1.0, %v2281_v7 }
 0x1ff   : > { %2284 = vrcp.f32 %v693_v9  ;;  %v658_v10 = vpop.f32.mrf.mxu2  ;;  %v2283_v13 = vpop.eup %2282  ;;  %936 = vmatpush.bf16.msrb.mxu0 %v2134_v48  ;;  %v2142_v48 = vld [vmem:[%s2921_s2 + $0x120] sm:$0xff] }
 0x200   : > { %2286 = vpow2.f32 %v682_v8  ;;  %v659_v11 = vadd.f32 %v2675_v39, %v658_v10  ;;  %v708_v17 = vmul.f32 %v2283_v13, %v652_v51  ;;  %v2131_v51 = vld [vmem:[%s2921_s2 + $0xc8] sm:$0xff] }
 0x202   : > { %v671_v12 = vsub.f32 0.0, %v659_v11 }
 0x203   : > { %937 = vmatpush.bf16.msrb.mxu0 %v2133_v49 }
 0x204   : > { %v684_v14 = vmul.f32 1.442695, %v671_v12 }
 0x205   : > { %v2285_v15 = vpop.eup %2284 }
 0x206   : > { %v2287_v16 = vpop.eup %2286  ;;  %v709_v18 = vmul.f32 %v2285_v15, %v654_v58  ;;  %2288 = vpow2.f32 %v684_v14 }
 0x207   : > { %v661_v19 = vpop.f32.mrf.mxu2  ;;  %v694_v22 = vadd.f32 1.0, %v2287_v16  ;;  %938 = vmatpush.bf16.msrb.mxu0 %v2132_v50 }
 0x208   : > { %v662_v20 = vadd.f32 %v2675_v39, %v661_v19  ;;  %v715_v21 = vpack.c.bf16 %v709_v18, %v708_v17 }
 0x209   : > { %2290 = vrcp.f32 %v694_v22 }
 0x20a   : > { %v672_v23 = vsub.f32 0.0, %v662_v20  ;;  %798 = vmatmul.bf16.gmra.mxu3 %v715_v21 }
 0x20b   : > { %939 = vmatpush.bf16.msrb.mxu0 %v2131_v51 }
 0x20c   : > { %v2289_v24 = vpop.eup %2288  ;;  %v686_v25 = vmul.f32 1.442695, %v672_v23 }
 0x20d   : > { %v695_v27 = vadd.f32 1.0, %v2289_v24 }
 0x20f   : > { %2292 = vrcp.f32 %v695_v27  ;;  %v663_v28 = vpop.f32.mrf.mxu2  ;;  %v2291_v31 = vpop.eup %2290  ;;  %940 = vmatpush.bf16.msrb.mxu0 %v2130_v53 }
 0x210   : > { %2294 = vpow2.f32 %v686_v25  ;;  %v664_v29 = vadd.f32 %v2675_v39, %v663_v28  ;;  %v710_v34 = vmul.f32 %v2291_v31, %v657_v3 }
 0x212   : > { %v673_v30 = vsub.f32 0.0, %v664_v29 }
 0x214   : > { %v688_v26 = vmul.f32 1.442695, %v673_v30 }
 0x215   : > { %v2293_v32 = vpop.eup %2292 }
 0x216   : > { %v2295_v33 = vpop.eup %2294  ;;  %v711_v35 = vmul.f32 %v2293_v32, %v659_v11  ;;  %2296 = vpow2.f32 %v688_v26 }
 0x217   : > { %v696_v37 = vadd.f32 1.0, %v2295_v33 }
 0x218   : > { %v716_v36 = vpack.c.bf16 %v711_v35, %v710_v34 }
 0x219   : > { %2298 = vrcp.f32 %v696_v37  ;;  %v2145_v37 = vld [vmem:[%s2921_s2 + $0x138] sm:$0xff] }
 0x21a   : > { %803 = vmatmul.bf16.gmra.mxu3 %v716_v36  ;;  %1081 = vmatpush.bf16.msra.mxu1 %v2145_v37 }
 0x21c   : > { %v2297_v38 = vpop.eup %2296 }
 0x21d   : > { %v697_v40 = vadd.f32 1.0, %v2297_v38 }
 0x21f   : > { %2300 = vrcp.f32 %v697_v40  ;;  %v2299_v41 = vpop.eup %2298 }
 0x220   : > { %v712_v43 = vmul.f32 %v2299_v41, %v662_v20  ;;  %v2144_v41 = vld [vmem:[%s2921_s2 + $0x130] sm:$0xff] }
 0x221   : > { %1082 = vmatpush.bf16.msra.mxu1 %v2144_v41 }
 0x225   : > { %v2301_v42 = vpop.eup %2300 }
 0x226   : > { %v713_v44 = vmul.f32 %v2301_v42, %v664_v29 }
 0x228   : > { %v717_v39 = vpack.c.bf16 %v713_v44, %v712_v43 }
 0x22a   : > { %808 = vmatmul.bf16.gmra.mxu3 %v717_v39  ;;  %v2143_v39 = vld [vmem:[%s2921_s2 + $0x128] sm:$0xff] }
 0x22b   : > { %1083 = vmatpush.bf16.msra.mxu1 %v2143_v39 }
 0x22f   : > { %1084 = vmatpush.bf16.msra.mxu1 %v2142_v48 }
 0x27d   : > { %v794_v54 = vpop.f32.mrf.mxu3 }
 0x27e   : > { %v795_v55 = vadd.f32 %v2712_v52, %v794_v54 }
 0x280   : > { %v814_v56 = vsub.f32 0.0, %v795_v55 }
 0x282   : > { %v822_v57 = vmul.f32 1.442695, %v814_v56 }
 0x284   : > { %2302 = vpow2.f32 %v822_v57 }
 0x285   : > { %v796_v58 = vpop.f32.mrf.mxu3 }
 0x286   : > { %v797_v59 = vadd.f32 %v2712_v52, %v796_v58 }
 0x288   : > { %v815_v60 = vsub.f32 0.0, %v797_v59 }
 0x28a   : > { %v824_v61 = vmul.f32 1.442695, %v815_v60  ;;  %v2303_v62 = vpop.eup %2302 }
 0x28b   : > { %v838_v1 = vadd.f32 1.0, %v2303_v62  ;;  %v2141_v62 = vld [vmem:[%s2921_s2 + $0x118] sm:$0xff] }
 0x28c   : > { %2304 = vpow2.f32 %v824_v61  ;;  %1085 = vmatpush.bf16.msra.mxu1 %v2141_v62 }
 0x28d   : > { %v799_v63 = vpop.f32.mrf.mxu3  ;;  %2306 = vrcp.f32 %v838_v1  ;;  %v2749_v1 = vld [vmem:[%s2922_s3 + $0x4] ss:$0 sm:$0xff] }
 0x28e   : > { %v800_v0 = vadd.f32 %v2712_v52, %v799_v63  ;;  %v2140_v63 = vld [vmem:[%s2921_s2 + $0x110] sm:$0xff] }
 0x290   : > { %v816_v2 = vsub.f32 0.0, %v800_v0  ;;  %1086 = vmatpush.bf16.msra.mxu1 %v2140_v63 }
 0x292   : > { %v2305_v3 = vpop.eup %2304  ;;  %v826_v4 = vmul.f32 1.442695, %v816_v2  ;;  %v2138_v2 = vld [vmem:[%s2921_s2 + $0x100] sm:$0xff] }
 0x293   : > { %v839_v5 = vadd.f32 1.0, %v2305_v3  ;;  %v2307_v9 = vpop.eup %2306 }
 0x294   : > { %v854_v13 = vmul.f32 %v2307_v9, %v795_v55 }
 0x295   : > { %2308 = vrcp.f32 %v839_v5  ;;  %v801_v6 = vpop.f32.mrf.mxu3 }
 0x296   : > { %2310 = vpow2.f32 %v826_v4  ;;  %v802_v7 = vadd.f32 %v2712_v52, %v801_v6 }
 0x298   : > { %v817_v8 = vsub.f32 0.0, %v802_v7 }
 0x29a   : > { %v828_v10 = vmul.f32 1.442695, %v817_v8 }
 0x29b   : > { %v2309_v11 = vpop.eup %2308 }
 0x29c   : > { %v2311_v12 = vpop.eup %2310  ;;  %v855_v14 = vmul.f32 %v2309_v11, %v797_v59  ;;  %2312 = vpow2.f32 %v828_v10 }
 0x29d   : > { %v804_v15 = vpop.f32.mrf.mxu3  ;;  %v840_v18 = vadd.f32 1.0, %v2311_v12 }
 0x29e   : > { %v805_v16 = vadd.f32 %v2712_v52, %v804_v15  ;;  %v862_v17 = vpack.c.bf16 %v855_v14, %v854_v13 }
 0x29f   : > { %2314 = vrcp.f32 %v840_v18 }
 0x2a0   : > { %v818_v19 = vsub.f32 0.0, %v805_v16  ;;  %941 = vmatmul.bf16.vlgmr.msrb.gmra.mxu0 %v862_v17 }
 0x2a2   : > { %v2313_v20 = vpop.eup %2312  ;;  %v830_v21 = vmul.f32 1.442695, %v818_v19 }
 0x2a3   : > { %v841_v22 = vadd.f32 1.0, %v2313_v20 }
 0x2a5   : > { %2316 = vrcp.f32 %v841_v22  ;;  %v806_v23 = vpop.f32.mrf.mxu3  ;;  %v2315_v27 = vpop.eup %2314 }
 0x2a6   : > { %2318 = vpow2.f32 %v830_v21  ;;  %v807_v24 = vadd.f32 %v2712_v52, %v806_v23  ;;  %v856_v31 = vmul.f32 %v2315_v27, %v800_v0  ;;  %v2139_v0 = vld [vmem:[%s2921_s2 + $0x108] sm:$0xff] }
 0x2a7   : > { %1087 = vmatpush.bf16.msra.mxu1 %v2139_v0 }
 0x2a8   : > { %v819_v25 = vsub.f32 0.0, %v807_v24 }
 0x2aa   : > { %v832_v28 = vmul.f32 1.442695, %v819_v25 }
 0x2ab   : > { %v2317_v29 = vpop.eup %2316  ;;  %1088 = vmatpush.bf16.msra.mxu1 %v2138_v2 }
 0x2ac   : > { %v2319_v30 = vpop.eup %2318  ;;  %v857_v26 = vmul.f32 %v2317_v29, %v802_v7  ;;  %2320 = vpow2.f32 %v832_v28 }
 0x2ad   : > { %v809_v32 = vpop.f32.mrf.mxu3  ;;  %v842_v35 = vadd.f32 1.0, %v2319_v30 }
 0x2ae   : > { %v810_v33 = vadd.f32 %v2712_v52, %v809_v32  ;;  %v863_v34 = vpack.c.bf16 %v857_v26, %v856_v31 }
 0x2af   : > { %2322 = vrcp.f32 %v842_v35 }
 0x2b0   : > { %v820_v36 = vsub.f32 0.0, %v810_v33  ;;  %946 = vmatmul.bf16.gmra.mxu0 %v863_v34 }
 0x2b2   : > { %v2321_v38 = vpop.eup %2320  ;;  %v834_v40 = vmul.f32 1.442695, %v820_v36 }
 0x2b3   : > { %v843_v42 = vadd.f32 1.0, %v2321_v38 }
 0x2b5   : > { %2324 = vrcp.f32 %v843_v42  ;;  %v811_v43 = vpop.f32.mrf.mxu3  ;;  %v2323_v46 = vpop.eup %2322 }
 0x2b6   : > { %2326 = vpow2.f32 %v834_v40  ;;  %v812_v44 = vadd.f32 %v2712_v52, %v811_v43  ;;  %v858_v51 = vmul.f32 %v2323_v46, %v805_v16 }
 0x2b8   : > { %v821_v45 = vsub.f32 0.0, %v812_v44 }
 0x2ba   : > { %v836_v47 = vmul.f32 1.442695, %v821_v45 }
 0x2bb   : > { %v2325_v49 = vpop.eup %2324 }
 0x2bc   : > { %v2327_v50 = vpop.eup %2326  ;;  %v859_v53 = vmul.f32 %v2325_v49, %v807_v24  ;;  %2328 = vpow2.f32 %v836_v47 }
 0x2bd   : > { %v844_v52 = vadd.f32 1.0, %v2327_v50  ;;  %v2153_v50 = vld [vmem:[%s2921_s2 + $0x178] sm:$0xff] }
 0x2be   : > { %v864_v54 = vpack.c.bf16 %v859_v53, %v858_v51  ;;  %1229 = vmatpush.bf16.msrb.mxu2 %v2153_v50 }
 0x2bf   : > { %2330 = vrcp.f32 %v844_v52 }
 0x2c0   : > { %951 = vmatmul.bf16.gmra.mxu0 %v864_v54  ;;  %v2152_v54 = vld [vmem:[%s2921_s2 + $0x170] sm:$0xff] }
 0x2c2   : > { %v2329_v55 = vpop.eup %2328  ;;  %1230 = vmatpush.bf16.msrb.mxu2 %v2152_v54 }
 0x2c3   : > { %v845_v56 = vadd.f32 1.0, %v2329_v55 }
 0x2c5   : > { %2332 = vrcp.f32 %v845_v56  ;;  %v2331_v57 = vpop.eup %2330 }
 0x2c6   : > { %v860_v59 = vmul.f32 %v2331_v57, %v810_v33  ;;  %v2151_v57 = vld [vmem:[%s2921_s2 + $0x168] sm:$0xff] }
 0x2c7   : > { %1231 = vmatpush.bf16.msrb.mxu2 %v2151_v57 }
 0x2cb   : > { %v2333_v58 = vpop.eup %2332 }
 0x2cc   : > { %v861_v60 = vmul.f32 %v2333_v58, %v812_v44 }
 0x2ce   : > { %v865_v61 = vpack.c.bf16 %v861_v60, %v860_v59 }
 0x2d0   : > { %956 = vmatmul.bf16.gmra.mxu0 %v865_v61  ;;  %v2150_v61 = vld [vmem:[%s2921_s2 + $0x160] sm:$0xff] }
 0x2d1   : > { %1232 = vmatpush.bf16.msrb.mxu2 %v2150_v61 }
 0x31d   : > { %v942_v3 = vpop.f32.mrf.mxu0 }
 0x31e   : > { %v943_v4 = vadd.f32 %v2749_v1, %v942_v3 }
 0x320   : > { %v962_v5 = vsub.f32 0.0, %v943_v4 }
 0x322   : > { %v970_v6 = vmul.f32 1.442695, %v962_v5 }
 0x324   : > { %2334 = vpow2.f32 %v970_v6 }
 0x325   : > { %v944_v7 = vpop.f32.mrf.mxu0 }
 0x326   : > { %v945_v8 = vadd.f32 %v2749_v1, %v944_v7 }
 0x328   : > { %v963_v9 = vsub.f32 0.0, %v945_v8 }
 0x32a   : > { %v972_v10 = vmul.f32 1.442695, %v963_v9  ;;  %v2335_v11 = vpop.eup %2334 }
 0x32b   : > { %v986_v14 = vadd.f32 1.0, %v2335_v11  ;;  %v2149_v11 = vld [vmem:[%s2921_s2 + $0x158] sm:$0xff] }
 0x32c   : > { %2336 = vpow2.f32 %v972_v10  ;;  %1233 = vmatpush.bf16.msrb.mxu2 %v2149_v11 }
 0x32d   : > { %v947_v12 = vpop.f32.mrf.mxu0  ;;  %2338 = vrcp.f32 %v986_v14  ;;  %v2786_v14 = vld [vmem:[%s2922_s3 + $0x5] ss:$0 sm:$0xff] }
 0x32e   : > { %v948_v13 = vadd.f32 %v2749_v1, %v947_v12  ;;  %v2148_v12 = vld [vmem:[%s2921_s2 + $0x150] sm:$0xff] }
 0x330   : > { %v964_v15 = vsub.f32 0.0, %v948_v13  ;;  %1234 = vmatpush.bf16.msrb.mxu2 %v2148_v12 }
 0x332   : > { %v2337_v16 = vpop.eup %2336  ;;  %v974_v17 = vmul.f32 1.442695, %v964_v15  ;;  %v2146_v15 = vld [vmem:[%s2921_s2 + $0x140] sm:$0xff] }
 0x333   : > { %v987_v18 = vadd.f32 1.0, %v2337_v16  ;;  %v2339_v22 = vpop.eup %2338 }
 0x334   : > { %v1002_v27 = vmul.f32 %v2339_v22, %v943_v4 }
 0x335   : > { %2340 = vrcp.f32 %v987_v18  ;;  %v949_v19 = vpop.f32.mrf.mxu0 }
 0x336   : > { %2342 = vpow2.f32 %v974_v17  ;;  %v950_v20 = vadd.f32 %v2749_v1, %v949_v19 }
 0x338   : > { %v965_v21 = vsub.f32 0.0, %v950_v20 }
 0x33a   : > { %v976_v23 = vmul.f32 1.442695, %v965_v21 }
 0x33b   : > { %v2341_v24 = vpop.eup %2340 }
 0x33c   : > { %v2343_v25 = vpop.eup %2342  ;;  %v1003_v28 = vmul.f32 %v2341_v24, %v945_v8  ;;  %2344 = vpow2.f32 %v976_v23 }
 0x33d   : > { %v952_v29 = vpop.f32.mrf.mxu0  ;;  %v988_v26 = vadd.f32 1.0, %v2343_v25 }
 0x33e   : > { %v1010_v30 = vpack.c.bf16 %v1003_v28, %v1002_v27  ;;  %v953_v31 = vadd.f32 %v2749_v1, %v952_v29 }
 0x33f   : > { %2346 = vrcp.f32 %v988_v26 }
 0x340   : > { %v966_v32 = vsub.f32 0.0, %v953_v31  ;;  %1089 = vmatmul.bf16.vlgmr.msra.gmra.mxu1 %v1010_v30 }
 0x342   : > { %v2345_v33 = vpop.eup %2344  ;;  %v978_v34 = vmul.f32 1.442695, %v966_v32 }
 0x343   : > { %v989_v35 = vadd.f32 1.0, %v2345_v33 }
 0x345   : > { %2348 = vrcp.f32 %v989_v35  ;;  %v954_v36 = vpop.f32.mrf.mxu0  ;;  %v2347_v40 = vpop.eup %2346 }
 0x346   : > { %2350 = vpow2.f32 %v978_v34  ;;  %v955_v37 = vadd.f32 %v2749_v1, %v954_v36  ;;  %v1004_v44 = vmul.f32 %v2347_v40, %v948_v13  ;;  %v2147_v13 = vld [vmem:[%s2921_s2 + $0x148] sm:$0xff] }
 0x347   : > { %1235 = vmatpush.bf16.msrb.mxu2 %v2147_v13 }
 0x348   : > { %v967_v38 = vsub.f32 0.0, %v955_v37 }
 0x34a   : > { %v980_v41 = vmul.f32 1.442695, %v967_v38 }
 0x34b   : > { %v2349_v42 = vpop.eup %2348  ;;  %1236 = vmatpush.bf16.msrb.mxu2 %v2146_v15 }
 0x34c   : > { %v2351_v43 = vpop.eup %2350  ;;  %v1005_v39 = vmul.f32 %v2349_v42, %v950_v20  ;;  %2352 = vpow2.f32 %v980_v41 }
 0x34d   : > { %v957_v45 = vpop.f32.mrf.mxu0  ;;  %v990_v48 = vadd.f32 1.0, %v2351_v43 }
 0x34e   : > { %v958_v46 = vadd.f32 %v2749_v1, %v957_v45  ;;  %v1011_v47 = vpack.c.bf16 %v1005_v39, %v1004_v44 }
 0x34f   : > { %2354 = vrcp.f32 %v990_v48 }
 0x350   : > { %v968_v49 = vsub.f32 0.0, %v958_v46  ;;  %1094 = vmatmul.bf16.gmra.mxu1 %v1011_v47 }
 0x352   : > { %v2353_v51 = vpop.eup %2352  ;;  %v982_v53 = vmul.f32 1.442695, %v968_v49 }
 0x353   : > { %v991_v52 = vadd.f32 1.0, %v2353_v51 }
 0x355   : > { %2356 = vrcp.f32 %v991_v52  ;;  %v959_v55 = vpop.f32.mrf.mxu0  ;;  %v2355_v59 = vpop.eup %2354 }
 0x356   : > { %2358 = vpow2.f32 %v982_v53  ;;  %v960_v56 = vadd.f32 %v2749_v1, %v959_v55  ;;  %v1006_v0 = vmul.f32 %v2355_v59, %v953_v31 }
 0x358   : > { %v969_v58 = vsub.f32 0.0, %v960_v56 }
 0x35a   : > { %v984_v60 = vmul.f32 1.442695, %v969_v58 }
 0x35b   : > { %v2357_v62 = vpop.eup %2356 }
 0x35c   : > { %v2359_v63 = vpop.eup %2358  ;;  %v1007_v2 = vmul.f32 %v2357_v62, %v955_v37  ;;  %2360 = vpow2.f32 %v984_v60 }
 0x35d   : > { %v992_v1 = vadd.f32 1.0, %v2359_v63  ;;  %v2161_v63 = vld [vmem:[%s2921_s2 + $0x1b8] sm:$0xff] }
 0x35e   : > { %v1012_v3 = vpack.c.bf16 %v1007_v2, %v1006_v0  ;;  %1377 = vmatpush.bf16.msrb.mxu3 %v2161_v63 }
 0x35f   : > { %2362 = vrcp.f32 %v992_v1 }
 0x360   : > { %1099 = vmatmul.bf16.gmra.mxu1 %v1012_v3  ;;  %v2160_v3 = vld [vmem:[%s2921_s2 + $0x1b0] sm:$0xff] }
 0x362   : > { %v2361_v4 = vpop.eup %2360  ;;  %1378 = vmatpush.bf16.msrb.mxu3 %v2160_v3 }
 0x363   : > { %v993_v5 = vadd.f32 1.0, %v2361_v4 }
 0x365   : > { %2364 = vrcp.f32 %v993_v5  ;;  %v2363_v6 = vpop.eup %2362 }
 0x366   : > { %v1008_v8 = vmul.f32 %v2363_v6, %v958_v46  ;;  %v2159_v6 = vld [vmem:[%s2921_s2 + $0x1a8] sm:$0xff] }
 0x367   : > { %1379 = vmatpush.bf16.msrb.mxu3 %v2159_v6 }
 0x36b   : > { %v2365_v7 = vpop.eup %2364 }
 0x36c   : > { %v1009_v9 = vmul.f32 %v2365_v7, %v960_v56 }
 0x36e   : > { %v1013_v10 = vpack.c.bf16 %v1009_v9, %v1008_v8 }
 0x370   : > { %1104 = vmatmul.bf16.gmra.mxu1 %v1013_v10  ;;  %v2158_v10 = vld [vmem:[%s2921_s2 + $0x1a0] sm:$0xff] }
 0x371   : > { %1380 = vmatpush.bf16.msrb.mxu3 %v2158_v10 }
 0x3bd   : > { %v1090_v16 = vpop.f32.mrf.mxu1 }
 0x3be   : > { %v1091_v17 = vadd.f32 %v2786_v14, %v1090_v16 }
 0x3c0   : > { %v1110_v18 = vsub.f32 0.0, %v1091_v17 }
 0x3c2   : > { %v1118_v19 = vmul.f32 1.442695, %v1110_v18 }
 0x3c4   : > { %2366 = vpow2.f32 %v1118_v19 }
 0x3c5   : > { %v1092_v20 = vpop.f32.mrf.mxu1 }
 0x3c6   : > { %v1093_v21 = vadd.f32 %v2786_v14, %v1092_v20 }
 0x3c8   : > { %v1111_v22 = vsub.f32 0.0, %v1093_v21 }
 0x3ca   : > { %v1120_v23 = vmul.f32 1.442695, %v1111_v22  ;;  %v2367_v24 = vpop.eup %2366 }
 0x3cb   : > { %v1134_v28 = vadd.f32 1.0, %v2367_v24  ;;  %v2157_v24 = vld [vmem:[%s2921_s2 + $0x198] sm:$0xff] }
 0x3cc   : > { %2368 = vpow2.f32 %v1120_v23  ;;  %1381 = vmatpush.bf16.msrb.mxu3 %v2157_v24 }
 0x3cd   : > { %v1095_v25 = vpop.f32.mrf.mxu1  ;;  %2370 = vrcp.f32 %v1134_v28  ;;  %v2823_v28 = vld [vmem:[%s2922_s3 + $0x6] ss:$0 sm:$0xff] }
 0x3ce   : > { %v1096_v27 = vadd.f32 %v2786_v14, %v1095_v25  ;;  %v2156_v25 = vld [vmem:[%s2921_s2 + $0x190] sm:$0xff] }
 0x3d0   : > { %v1112_v29 = vsub.f32 0.0, %v1096_v27  ;;  %1382 = vmatpush.bf16.msrb.mxu3 %v2156_v25 }
 0x3d2   : > { %v2369_v30 = vpop.eup %2368  ;;  %v1122_v31 = vmul.f32 1.442695, %v1112_v29  ;;  %v2154_v29 = vld [vmem:[%s2921_s2 + $0x180] sm:$0xff] }
 0x3d3   : > { %v1135_v26 = vadd.f32 1.0, %v2369_v30  ;;  %v2371_v35 = vpop.eup %2370 }
 0x3d4   : > { %v1150_v40 = vmul.f32 %v2371_v35, %v1091_v17 }
 0x3d5   : > { %2372 = vrcp.f32 %v1135_v26  ;;  %v1097_v32 = vpop.f32.mrf.mxu1 }
 0x3d6   : > { %2374 = vpow2.f32 %v1122_v31  ;;  %v1098_v33 = vadd.f32 %v2786_v14, %v1097_v32 }
 0x3d8   : > { %v1113_v34 = vsub.f32 0.0, %v1098_v33 }
 0x3da   : > { %v1124_v36 = vmul.f32 1.442695, %v1113_v34 }
 0x3db   : > { %v2373_v37 = vpop.eup %2372 }
 0x3dc   : > { %v2375_v38 = vpop.eup %2374  ;;  %v1151_v41 = vmul.f32 %v2373_v37, %v1093_v21  ;;  %2376 = vpow2.f32 %v1124_v36 }
 0x3dd   : > { %v1100_v42 = vpop.f32.mrf.mxu1  ;;  %v1136_v39 = vadd.f32 1.0, %v2375_v38 }
 0x3de   : > { %v1101_v43 = vadd.f32 %v2786_v14, %v1100_v42  ;;  %v1158_v44 = vpack.c.bf16 %v1151_v41, %v1150_v40 }
 0x3df   : > { %2378 = vrcp.f32 %v1136_v39 }
 0x3e0   : > { %v1114_v45 = vsub.f32 0.0, %v1101_v43  ;;  %1237 = vmatmul.bf16.vlgmr.msrb.gmra.mxu2 %v1158_v44 }
 0x3e2   : > { %v2377_v46 = vpop.eup %2376  ;;  %v1126_v47 = vmul.f32 1.442695, %v1114_v45 }
 0x3e3   : > { %v1137_v48 = vadd.f32 1.0, %v2377_v46 }
 0x3e5   : > { %2380 = vrcp.f32 %v1137_v48  ;;  %v1102_v49 = vpop.f32.mrf.mxu1  ;;  %v2379_v53 = vpop.eup %2378 }
 0x3e6   : > { %2382 = vpow2.f32 %v1126_v47  ;;  %v1103_v50 = vadd.f32 %v2786_v14, %v1102_v49  ;;  %v1152_v56 = vmul.f32 %v2379_v53, %v1096_v27  ;;  %v2155_v27 = vld [vmem:[%s2921_s2 + $0x188] sm:$0xff] }
 0x3e7   : > { %1383 = vmatpush.bf16.msrb.mxu3 %v2155_v27 }
 0x3e8   : > { %v1115_v51 = vsub.f32 0.0, %v1103_v50 }
 0x3ea   : > { %v1128_v54 = vmul.f32 1.442695, %v1115_v51 }
 0x3eb   : > { %v2381_v52 = vpop.eup %2380  ;;  %1384 = vmatpush.bf16.msrb.mxu3 %v2154_v29 }
 0x3ec   : > { %v2383_v55 = vpop.eup %2382  ;;  %v1153_v57 = vmul.f32 %v2381_v52, %v1098_v33  ;;  %2384 = vpow2.f32 %v1128_v54 }
 0x3ed   : > { %v1105_v58 = vpop.f32.mrf.mxu1  ;;  %v1138_v61 = vadd.f32 1.0, %v2383_v55 }
 0x3ee   : > { %v1106_v59 = vadd.f32 %v2786_v14, %v1105_v58  ;;  %v1159_v60 = vpack.c.bf16 %v1153_v57, %v1152_v56 }
 0x3ef   : > { %2386 = vrcp.f32 %v1138_v61 }
 0x3f0   : > { %v1116_v62 = vsub.f32 0.0, %v1106_v59  ;;  %1242 = vmatmul.bf16.gmra.mxu2 %v1159_v60 }
 0x3f2   : > { %v2385_v0 = vpop.eup %2384  ;;  %v1130_v2 = vmul.f32 1.442695, %v1116_v62 }
 0x3f3   : > { %v1139_v1 = vadd.f32 1.0, %v2385_v0 }
 0x3f5   : > { %2388 = vrcp.f32 %v1139_v1  ;;  %v1107_v4 = vpop.f32.mrf.mxu1  ;;  %v2387_v8 = vpop.eup %2386 }
 0x3f6   : > { %2390 = vpow2.f32 %v1130_v2  ;;  %v1108_v5 = vadd.f32 %v2786_v14, %v1107_v4  ;;  %v1154_v13 = vmul.f32 %v2387_v8, %v1101_v43 }
 0x3f8   : > { %v1117_v7 = vsub.f32 0.0, %v1108_v5 }
 0x3fa   : > { %v1132_v9 = vmul.f32 1.442695, %v1117_v7 }
 0x3fb   : > { %v2389_v11 = vpop.eup %2388 }
 0x3fc   : > { %v2391_v12 = vpop.eup %2390  ;;  %v1155_v15 = vmul.f32 %v2389_v11, %v1103_v50  ;;  %2392 = vpow2.f32 %v1132_v9 }
 0x3fd   : > { %v1140_v14 = vadd.f32 1.0, %v2391_v12  ;;  %v2169_v12 = vld [vmem:[%s2921_s2 + $0x1f8] sm:$0xff] }
 0x3fe   : > { %v1160_v16 = vpack.c.bf16 %v1155_v15, %v1154_v13  ;;  %1525 = vmatpush.bf16.msra.mxu0 %v2169_v12 }
 0x3ff   : > { %2394 = vrcp.f32 %v1140_v14 }
 0x400   : > { %1247 = vmatmul.bf16.gmra.mxu2 %v1160_v16  ;;  %v2168_v16 = vld [vmem:[%s2921_s2 + $0x1f0] sm:$0xff] }
 0x402   : > { %v2393_v17 = vpop.eup %2392  ;;  %1526 = vmatpush.bf16.msra.mxu0 %v2168_v16 }
 0x403   : > { %v1141_v18 = vadd.f32 1.0, %v2393_v17 }
 0x405   : > { %2396 = vrcp.f32 %v1141_v18  ;;  %v2395_v19 = vpop.eup %2394 }
 0x406   : > { %v1156_v21 = vmul.f32 %v2395_v19, %v1106_v59  ;;  %v2167_v19 = vld [vmem:[%s2921_s2 + $0x1e8] sm:$0xff] }
 0x407   : > { %1527 = vmatpush.bf16.msra.mxu0 %v2167_v19 }
 0x40b   : > { %v2397_v20 = vpop.eup %2396 }
 0x40c   : > { %v1157_v22 = vmul.f32 %v2397_v20, %v1108_v5 }
 0x40e   : > { %v1161_v23 = vpack.c.bf16 %v1157_v22, %v1156_v21 }
 0x410   : > { %1252 = vmatmul.bf16.gmra.mxu2 %v1161_v23  ;;  %v2166_v23 = vld [vmem:[%s2921_s2 + $0x1e0] sm:$0xff] }
 0x411   : > { %1528 = vmatpush.bf16.msra.mxu0 %v2166_v23 }
 0x463   : > { %v1238_v30 = vpop.f32.mrf.mxu2 }
 0x464   : > { %v1239_v31 = vadd.f32 %v2823_v28, %v1238_v30 }
 0x466   : > { %v1258_v26 = vsub.f32 0.0, %v1239_v31 }
 0x468   : > { %v1266_v32 = vmul.f32 1.442695, %v1258_v26 }
 0x46a   : > { %2398 = vpow2.f32 %v1266_v32 }
 0x46b   : > { %v1240_v33 = vpop.f32.mrf.mxu2 }
 0x46c   : > { %v1241_v34 = vadd.f32 %v2823_v28, %v1240_v33 }
 0x46e   : > { %v1259_v35 = vsub.f32 0.0, %v1241_v34 }
 0x470   : > { %v1268_v36 = vmul.f32 1.442695, %v1259_v35  ;;  %v2399_v37 = vpop.eup %2398 }
 0x471   : > { %v1282_v41 = vadd.f32 1.0, %v2399_v37  ;;  %v2165_v37 = vld [vmem:[%s2921_s2 + $0x1d8] sm:$0xff] }
 0x472   : > { %2400 = vpow2.f32 %v1268_v36  ;;  %1529 = vmatpush.bf16.msra.mxu0 %v2165_v37 }
 0x473   : > { %v1243_v38 = vpop.f32.mrf.mxu2  ;;  %2402 = vrcp.f32 %v1282_v41  ;;  %v2860_v41 = vld [vmem:[%s2922_s3 + $0x7] ss:$0 sm:$0xff] }
 0x474   : > { %v1244_v40 = vadd.f32 %v2823_v28, %v1243_v38  ;;  %v2164_v38 = vld [vmem:[%s2921_s2 + $0x1d0] sm:$0xff] }
 0x476   : > { %v1260_v42 = vsub.f32 0.0, %v1244_v40  ;;  %1530 = vmatpush.bf16.msra.mxu0 %v2164_v38 }
 0x478   : > { %v2401_v43 = vpop.eup %2400  ;;  %v1270_v44 = vmul.f32 1.442695, %v1260_v42  ;;  %v2162_v42 = vld [vmem:[%s2921_s2 + $0x1c0] sm:$0xff] }
 0x479   : > { %v1283_v39 = vadd.f32 1.0, %v2401_v43  ;;  %v2403_v48 = vpop.eup %2402 }
 0x47a   : > { %v1298_v53 = vmul.f32 %v2403_v48, %v1239_v31 }
 0x47b   : > { %2404 = vrcp.f32 %v1283_v39  ;;  %v1245_v45 = vpop.f32.mrf.mxu2 }
 0x47c   : > { %2406 = vpow2.f32 %v1270_v44  ;;  %v1246_v46 = vadd.f32 %v2823_v28, %v1245_v45 }
 0x47e   : > { %v1261_v47 = vsub.f32 0.0, %v1246_v46 }
 0x480   : > { %v1272_v49 = vmul.f32 1.442695, %v1261_v47 }
 0x481   : > { %v2405_v50 = vpop.eup %2404 }
 0x482   : > { %v2407_v51 = vpop.eup %2406  ;;  %v1299_v54 = vmul.f32 %v2405_v50, %v1241_v34  ;;  %2408 = vpow2.f32 %v1272_v49 }
 0x483   : > { %v1248_v52 = vpop.f32.mrf.mxu2  ;;  %v1284_v57 = vadd.f32 1.0, %v2407_v51 }
 0x484   : > { %v1249_v55 = vadd.f32 %v2823_v28, %v1248_v52  ;;  %v1306_v56 = vpack.c.bf16 %v1299_v54, %v1298_v53 }
 0x485   : > { %2410 = vrcp.f32 %v1284_v57 }
 0x486   : > { %v1262_v58 = vsub.f32 0.0, %v1249_v55  ;;  %1385 = vmatmul.bf16.vlgmr.msrb.gmra.mxu3 %v1306_v56 }
 0x488   : > { %v2409_v59 = vpop.eup %2408  ;;  %v1274_v60 = vmul.f32 1.442695, %v1262_v58 }
 0x489   : > { %v1285_v61 = vadd.f32 1.0, %v2409_v59 }
 0x48b   : > { %2412 = vrcp.f32 %v1285_v61  ;;  %v1250_v62 = vpop.f32.mrf.mxu2  ;;  %v2411_v2 = vpop.eup %2410 }
 0x48c   : > { %2414 = vpow2.f32 %v1274_v60  ;;  %v1251_v63 = vadd.f32 %v2823_v28, %v1250_v62  ;;  %v1300_v5 = vmul.f32 %v2411_v2, %v1244_v40  ;;  %v2163_v40 = vld [vmem:[%s2921_s2 + $0x1c8] sm:$0xff] }
 0x48d   : > { %1531 = vmatpush.bf16.msra.mxu0 %v2163_v40 }
 0x48e   : > { %v1263_v0 = vsub.f32 0.0, %v1251_v63 }
 0x490   : > { %v1276_v3 = vmul.f32 1.442695, %v1263_v0 }
 0x491   : > { %v2413_v1 = vpop.eup %2412  ;;  %1532 = vmatpush.bf16.msra.mxu0 %v2162_v42 }
 0x492   : > { %v2415_v4 = vpop.eup %2414  ;;  %v1301_v6 = vmul.f32 %v2413_v1, %v1246_v46  ;;  %2416 = vpow2.f32 %v1276_v3 }
 0x493   : > { %v1253_v7 = vpop.f32.mrf.mxu2  ;;  %v1286_v10 = vadd.f32 1.0, %v2415_v4 }
 0x494   : > { %v1254_v8 = vadd.f32 %v2823_v28, %v1253_v7  ;;  %v1307_v9 = vpack.c.bf16 %v1301_v6, %v1300_v5 }
 0x495   : > { %2418 = vrcp.f32 %v1286_v10 }
 0x496   : > { %v1264_v11 = vsub.f32 0.0, %v1254_v8  ;;  %1390 = vmatmul.bf16.gmra.mxu3 %v1307_v9 }
 0x498   : > { %v2417_v13 = vpop.eup %2416  ;;  %v1278_v15 = vmul.f32 1.442695, %v1264_v11 }
 0x499   : > { %v1287_v14 = vadd.f32 1.0, %v2417_v13 }
 0x49b   : > { %2420 = vrcp.f32 %v1287_v14  ;;  %v1255_v17 = vpop.f32.mrf.mxu2  ;;  %v2419_v21 = vpop.eup %2418 }
 0x49c   : > { %2422 = vpow2.f32 %v1278_v15  ;;  %v1256_v18 = vadd.f32 %v2823_v28, %v1255_v17  ;;  %v1302_v27 = vmul.f32 %v2419_v21, %v1249_v55 }
 0x49e   : > { %v1265_v20 = vsub.f32 0.0, %v1256_v18 }
 0x4a0   : > { %v1280_v22 = vmul.f32 1.442695, %v1265_v20 }
 0x4a1   : > { %v2421_v24 = vpop.eup %2420 }
 0x4a2   : > { %v2423_v25 = vpop.eup %2422  ;;  %v1303_v29 = vmul.f32 %v2421_v24, %v1251_v63  ;;  %2424 = vpow2.f32 %v1280_v22 }
 0x4a3   : > { %v1288_v28 = vadd.f32 1.0, %v2423_v25 }
 0x4a4   : > { %v1308_v30 = vpack.c.bf16 %v1303_v29, %v1302_v27 }
 0x4a5   : > { %2426 = vrcp.f32 %v1288_v28 }
 0x4a6   : > { %1395 = vmatmul.bf16.gmra.mxu3 %v1308_v30 }
 0x4a8   : > { %v2425_v31 = vpop.eup %2424 }
 0x4a9   : > { %v1289_v26 = vadd.f32 1.0, %v2425_v31 }
 0x4ab   : > { %2428 = vrcp.f32 %v1289_v26  ;;  %v2427_v32 = vpop.eup %2426 }
 0x4ac   : > { %v1304_v34 = vmul.f32 %v2427_v32, %v1254_v8 }
 0x4b1   : > { %v2429_v33 = vpop.eup %2428 }
 0x4b2   : > { %v1305_v35 = vmul.f32 %v2429_v33, %v1256_v18 }
 0x4b4   : > { %v1309_v36 = vpack.c.bf16 %v1305_v35, %v1304_v34 }
 0x4b6   : > { %1400 = vmatmul.bf16.gmra.mxu3 %v1309_v36 }
 0x509   : > { %v1386_v43 = vpop.f32.mrf.mxu3 }
 0x50a   : > { %v1387_v44 = vadd.f32 %v2860_v41, %v1386_v43 }
 0x50c   : > { %v1406_v39 = vsub.f32 0.0, %v1387_v44 }
 0x50e   : > { %v1414_v45 = vmul.f32 1.442695, %v1406_v39 }
 0x510   : > { %2430 = vpow2.f32 %v1414_v45 }
 0x511   : > { %v1388_v46 = vpop.f32.mrf.mxu3 }
 0x512   : > { %v1389_v47 = vadd.f32 %v2860_v41, %v1388_v46 }
 0x514   : > { %v1407_v48 = vsub.f32 0.0, %v1389_v47 }
 0x516   : > { %v1416_v49 = vmul.f32 1.442695, %v1407_v48  ;;  %v2431_v50 = vpop.eup %2430 }
 0x517   : > { %v1430_v54 = vadd.f32 1.0, %v2431_v50  ;;  %v2205_v50 = vld [vmem:[%s2922_s3 + $0x8] ss:$0 sm:$0xff] }
 0x518   : > { %2432 = vpow2.f32 %v1416_v49 }
 0x519   : > { %v1391_v51 = vpop.f32.mrf.mxu3  ;;  %2434 = vrcp.f32 %v1430_v54 }
 0x51a   : > { %v1392_v53 = vadd.f32 %v2860_v41, %v1391_v51 }
 0x51c   : > { %v1408_v52 = vsub.f32 0.0, %v1392_v53 }
 0x51e   : > { %v2433_v55 = vpop.eup %2432  ;;  %v1418_v56 = vmul.f32 1.442695, %v1408_v52 }
 0x51f   : > { %v1431_v57 = vadd.f32 1.0, %v2433_v55  ;;  %v2435_v61 = vpop.eup %2434 }
 0x520   : > { %v1446_v2 = vmul.f32 %v2435_v61, %v1387_v44 }
 0x521   : > { %2436 = vrcp.f32 %v1431_v57  ;;  %v1393_v58 = vpop.f32.mrf.mxu3 }
 0x522   : > { %2438 = vpow2.f32 %v1418_v56  ;;  %v1394_v59 = vadd.f32 %v2860_v41, %v1393_v58 }
 0x524   : > { %v1409_v60 = vsub.f32 0.0, %v1394_v59 }
 0x526   : > { %v1420_v62 = vmul.f32 1.442695, %v1409_v60 }
 0x527   : > { %v2437_v63 = vpop.eup %2436 }
 0x528   : > { %v2439_v0 = vpop.eup %2438  ;;  %v1447_v3 = vmul.f32 %v2437_v63, %v1389_v47  ;;  %2440 = vpow2.f32 %v1420_v62 }
 0x529   : > { %v1396_v1 = vpop.f32.mrf.mxu3  ;;  %v1432_v6 = vadd.f32 1.0, %v2439_v0 }
 0x52a   : > { %v1454_v4 = vpack.c.bf16 %v1447_v3, %v1446_v2  ;;  %v1397_v5 = vadd.f32 %v2860_v41, %v1396_v1 }
 0x52b   : > { %2442 = vrcp.f32 %v1432_v6 }
 0x52c   : > { %v1410_v7 = vsub.f32 0.0, %v1397_v5  ;;  %1533 = vmatmul.bf16.vlgmr.msra.gmra.mxu0 %v1454_v4 }
 0x52e   : > { %v2441_v8 = vpop.eup %2440  ;;  %v1422_v9 = vmul.f32 1.442695, %v1410_v7 }
 0x52f   : > { %v1433_v10 = vadd.f32 1.0, %v2441_v8 }
 0x531   : > { %2444 = vrcp.f32 %v1433_v10  ;;  %v1398_v11 = vpop.f32.mrf.mxu3  ;;  %v2443_v15 = vpop.eup %2442 }
 0x532   : > { %2446 = vpow2.f32 %v1422_v9  ;;  %v1399_v12 = vadd.f32 %v2860_v41, %v1398_v11  ;;  %v1448_v18 = vmul.f32 %v2443_v15, %v1392_v53 }
 0x534   : > { %v1411_v13 = vsub.f32 0.0, %v1399_v12 }
 0x536   : > { %v1424_v16 = vmul.f32 1.442695, %v1411_v13 }
 0x537   : > { %v2445_v14 = vpop.eup %2444 }
 0x538   : > { %v2447_v17 = vpop.eup %2446  ;;  %v1449_v19 = vmul.f32 %v2445_v14, %v1394_v59  ;;  %2448 = vpow2.f32 %v1424_v16 }
 0x539   : > { %v1401_v20 = vpop.f32.mrf.mxu3  ;;  %v1434_v23 = vadd.f32 1.0, %v2447_v17 }
 0x53a   : > { %v1402_v21 = vadd.f32 %v2860_v41, %v1401_v20  ;;  %v1455_v22 = vpack.c.bf16 %v1449_v19, %v1448_v18  ;;  %v2518_v19 = vmov 0.0  }
 0x53b   : > { %2450 = vrcp.f32 %v1434_v23  ;;  %282 = vst [vmem:[%s2895_s11] sm:$0x1] %v2518_v19 }
 0x53c   : > { %v1412_v24 = vsub.f32 0.0, %v1402_v21  ;;  %1538 = vmatmul.bf16.gmra.mxu0 %v1455_v22 }
 0x53e   : > { %v2449_v25 = vpop.eup %2448  ;;  %v1426_v27 = vmul.f32 1.442695, %v1412_v24 }
 0x53f   : > { %v1435_v29 = vadd.f32 1.0, %v2449_v25 }
 0x541   : > { %2452 = vrcp.f32 %v1435_v29  ;;  %v1403_v30 = vpop.f32.mrf.mxu3  ;;  %v2451_v26 = vpop.eup %2450 }
 0x542   : > { %2454 = vpow2.f32 %v1426_v27  ;;  %v1404_v28 = vadd.f32 %v2860_v41, %v1403_v30  ;;  %v1450_v35 = vmul.f32 %v2451_v26, %v1397_v5 }
 0x544   : > { %v1413_v31 = vsub.f32 0.0, %v1404_v28 }
 0x546   : > { %v1428_v32 = vmul.f32 1.442695, %v1413_v31 }
 0x547   : > { %v2453_v33 = vpop.eup %2452 }
 0x548   : > { %v2455_v34 = vpop.eup %2454  ;;  %v1451_v36 = vmul.f32 %v2453_v33, %v1399_v12  ;;  %2456 = vpow2.f32 %v1428_v32 }
 0x549   : > { %v1436_v38 = vadd.f32 1.0, %v2455_v34 }
 0x54a   : > { %v1456_v37 = vpack.c.bf16 %v1451_v36, %v1450_v35 }
 0x54b   : > { %2458 = vrcp.f32 %v1436_v38 }
 0x54c   : > { %1543 = vmatmul.bf16.gmra.mxu0 %v1456_v37 }
 0x54e   : > { %v2457_v40 = vpop.eup %2456 }
 0x54f   : > { %v1437_v42 = vadd.f32 1.0, %v2457_v40 }
 0x551   : > { %2460 = vrcp.f32 %v1437_v42  ;;  %v2459_v43 = vpop.eup %2458 }
 0x552   : > { %v1452_v39 = vmul.f32 %v2459_v43, %v1402_v21 }
 0x557   : > { %v2461_v44 = vpop.eup %2460 }
 0x558   : > { %v1453_v45 = vmul.f32 %v2461_v44, %v1404_v28 }
 0x55a   : > { %v1457_v41 = vpack.c.bf16 %v1453_v45, %v1452_v39 }
 0x55c   : > { %1548 = vmatmul.bf16.gmra.mxu0 %v1457_v41 }
 0x5a9   : > { %v1534_v46 = vpop.f32.mrf.mxu0 }
 0x5aa   : > { %v2876_v53 = vadd.f32 %v2205_v50, %v1534_v46 }
 0x5ac   : > { %v1554_v57 = vsub.f32 0.0, %v2876_v53 }
 0x5ae   : > { %v1562_v62 = vmul.f32 1.442695, %v1554_v57 }
 0x5b1   : > { %v1536_v47 = vpop.f32.mrf.mxu0 }
 0x5b2   : > { %v1537_v51 = vadd.f32 %v2205_v50, %v1536_v47 }
 0x5b4   : > { %v1555_v55 = vsub.f32 0.0, %v1537_v51 }
 0x5b6   : > { %v1564_v60 = vmul.f32 1.442695, %v1555_v55 }
 0x5b8   : > { %2462 = vpow2.f32 %v1564_v60  ;;  %v1602_v60 = vld [vmem:[%s2895_s11] sm:$0x1] }
 0x5b9   : > { %v1539_v48 = vpop.f32.mrf.mxu0  ;;  %2464 = vpow2.f32 %v1562_v62 }
 0x5ba   : > { %v2878_v52 = vadd.f32 %v2205_v50, %v1539_v48 }
 0x5bc   : > { %v1556_v58 = vsub.f32 0.0, %v2878_v52 }
 0x5be   : > { %v1566_v0 = vmul.f32 1.442695, %v1556_v58  ;;  %v2463_v8 = vpop.eup %2462 }
 0x5bf   : > { %v2465_v10 = vpop.eup %2464  ;;  %v1579_v13 = vadd.f32 1.0, %v2463_v8 }
 0x5c0   : > { %2466 = vpow2.f32 %v1566_v0  ;;  %v1578_v16 = vadd.f32 1.0, %v2465_v10  ;;  %v1623_v0 = vld [vmem:[%s2923_s4] sm:$0x1] }
 0x5c1   : > { %v1541_v49 = vpop.f32.mrf.mxu0 }
 0x5c2   : > { %v2880_v56 = vadd.f32 %v2205_v50, %v1541_v49 }
 0x5c4   : > { %v1557_v61 = vsub.f32 0.0, %v2880_v56 }
 0x5c6   : > { %v1568_v1 = vmul.f32 1.442695, %v1557_v61  ;;  %v2467_v11 = vpop.eup %2466 }
 0x5c7   : > { %v1580_v17 = vadd.f32 1.0, %v2467_v11 }
 0x5c8   : > { %2468 = vpow2.f32 %v1568_v1 }
 0x5c9   : > { %v1544_v54 = vpop.f32.mrf.mxu0 }
 0x5ca   : > { %v2884_v59 = vadd.f32 %v2205_v50, %v1544_v54 }
 0x5cc   : > { %v1558_v2 = vsub.f32 0.0, %v2884_v59 }
 0x5ce   : > { %v1570_v5 = vmul.f32 1.442695, %v1558_v2  ;;  %v2469_v15 = vpop.eup %2468 }
 0x5cf   : > { %v1581_v20 = vadd.f32 1.0, %v2469_v15 }
 0x5d0   : > { %2470 = vpow2.f32 %v1570_v5 }
 0x5d1   : > { %v1546_v63 = vpop.f32.mrf.mxu0 }
 0x5d2   : > { %v2888_v3 = vadd.f32 %v2205_v50, %v1546_v63 }
 0x5d4   : > { %v1559_v4 = vsub.f32 0.0, %v2888_v3 }
 0x5d6   : > { %v1572_v6 = vmul.f32 1.442695, %v1559_v4  ;;  %v2471_v18 = vpop.eup %2470  ;;  %v1630_v4 = vstv %s1629_s13 }
 0x5d7   : > { %v1582_v24 = vadd.f32 1.0, %v2471_v18 }
 0x5d8   : > { %2472 = vpow2.f32 %v1572_v6 }
 0x5d9   : > { %v1549_v7 = vpop.f32.mrf.mxu0 }
 0x5da   : > { %v1550_v9 = vadd.f32 %v2205_v50, %v1549_v7 }
 0x5dc   : > { %v1560_v12 = vsub.f32 0.0, %v1550_v9 }
 0x5de   : > { %v1574_v14 = vmul.f32 1.442695, %v1560_v12  ;;  %v2473_v22 = vpop.eup %2472 }
 0x5df   : > { %v1583_v27 = vadd.f32 1.0, %v2473_v22 }
 0x5e0   : > { %2474 = vpow2.f32 %v1574_v14 }
 0x5e1   : > { %2476 = vrcp.f32 %v1579_v13  ;;  %v1551_v21 = vpop.f32.mrf.mxu0 }
 0x5e2   : > { %2478 = vrcp.f32 %v1578_v16  ;;  %v1552_v23 = vadd.f32 %v2205_v50, %v1551_v21 }
 0x5e3   : > { %2480 = vrcp.f32 %v1580_v17 }
 0x5e4   : > { %v1561_v25 = vsub.f32 0.0, %v1552_v23  ;;  %2482 = vrcp.f32 %v1581_v20 }
 0x5e5   : > { %2484 = vrcp.f32 %v1582_v24 }
 0x5e6   : > { %v2475_v29 = vpop.eup %2474  ;;  %v1576_v30 = vmul.f32 1.442695, %v1561_v25 }
 0x5e7   : > { %v2477_v28 = vpop.eup %2476  ;;  %v1584_v31 = vadd.f32 1.0, %v2475_v29 }
 0x5e8   : > { %v2479_v26 = vpop.eup %2478  ;;  %2486 = vpow2.f32 %v1576_v30  ;;  %v1595_v33 = vmul.f32 %v2477_v28, %v1537_v51 }
 0x5e9   : > { %v2481_v32 = vpop.eup %2480  ;;  %2488 = vrcp.f32 %v1583_v27  ;;  %v1594_v35 = vmul.f32 %v2479_v26, %v2876_v53 }
 0x5ea   : > { %v2483_v34 = vpop.eup %2482  ;;  %2490 = vrcp.f32 %v1584_v31  ;;  %v1596_v36 = vmul.f32 %v2481_v32, %v2878_v52 }
 0x5eb   : > { %v2485_v37 = vpop.eup %2484  ;;  %v1603_v40 = vadd.f32 %v1595_v33, %v1594_v35  ;;  %v1597_v42 = vmul.f32 %v2483_v34, %v2880_v56 }
 0x5ec   : > { %v1598_v45 = vmul.f32 %v2485_v37, %v2884_v59 }
 0x5ed   : > { %v1604_v39 = vadd.f32 %v1603_v40, %v1596_v36 }
 0x5ee   : > { %v2487_v38 = vpop.eup %2486 }
 0x5ef   : > { %v2489_v43 = vpop.eup %2488  ;;  %v1585_v44 = vadd.f32 1.0, %v2487_v38  ;;  %v1605_v46 = vadd.f32 %v1604_v39, %v1597_v42 }
 0x5f0   : > { %v2491_v41 = vpop.eup %2490  ;;  %v1599_v47 = vmul.f32 %v2489_v43, %v2888_v3 }
 0x5f1   : > { %2492 = vrcp.f32 %v1585_v44  ;;  %v1606_v48 = vadd.f32 %v1605_v46, %v1598_v45  ;;  %v1600_v49 = vmul.f32 %v2491_v41, %v1550_v9 }
 0x5f3   : > { %v1607_v50 = vadd.f32 %v1606_v48, %v1599_v47 }
 0x5f5   : > { %v1608_v53 = vadd.f32 %v1607_v50, %v1600_v49 }
 0x5f7   : > { %v2493_v51 = vpop.eup %2492 }
 0x5f8   : > { %v1601_v54 = vmul.f32 %v2493_v51, %v1552_v23 }
 0x5fa   : > { %v1609_v52 = vadd.f32 %v1608_v53, %v1601_v54 }
 0x5fc   : > { %v1610_v55 = vrot.slane %v1609_v52, 4 }
 0x5fe   : > { %v1611_v56 = vadd.f32 %v1610_v55, %v1609_v52 }
 0x600   : > { %v1612_v57 = vrot.slane %v1611_v56, 2 }
 0x602   : > { %v1613_v58 = vadd.f32 %v1612_v57, %v1611_v56 }
 0x604   : > { %v1614_v59 = vrot.slane %v1613_v58, 1 }
 0x606   : > { %v1615_v61 = vadd.f32 %v1614_v59, %v1613_v58 }
 0x608   : > { %v1616_v62 = vadd.f32 %v1615_v61, %v1602_v60 }
 0x60a   : > { %1617 = vst [vmem:[%s2895_s11] sm:$0x1] %v1616_v62 }
 0x611   : > { %v1621_v63 = vld [vmem:[%s2895_s11] sm:$0x1] }
 0x612   : > { %v1622_v2 = vmul.f32 0.015625, %v1621_v63 }
 0x614   : > { %v1624_v3 = vmul.f32 %v1623_v0, %v1622_v2 }
 0x616   : > { %v1626_v1 = vsel %vm1625_vm1, %v1624_v3, 0.0 }
 0x617   : > { %1627 = vadd.xlane.f32.xlu0 %v1626_v1 }
 0x68a   : > { %v1628_v5 = vpop.xlane.xlu0 %1627 }
 0x68b   : > { %v1631_v6 = vadd.f32 %v1630_v4, %v1628_v5 }
 0x68d   : > { %1632 = vst [vmem:[%s2895_s11] sm:$0x1] %v1631_v6 }
 0x68e PF: > { %s17_s25 = sadd.s32 1, %s2516_s25   ;;  %s2926_s23 = smov %s2512_s24 }
 0x68f   : > { %p14_p5 = scmp.ge.s32.totalorder %s17_s25, 4   ;;  %s2927_s24 = smov %s2929_s5 }
 0x691   :  { %16 = sbr.rel (!%p14_p5) target bundleno = 2 (0x2), region = 89 }

</bundles_post_ra>
